<compile_context>
chip_gen: v7x
topology: tpu7x:2x2x1
jax: 0.10.0
libtpu: 0.0.40
codegen_flags: <defaults>
</compile_context>

<pallas_src>
import jax
import jax.numpy as jnp
from jax import lax
from jax.experimental import pallas as pl
from jax.experimental.pallas import tpu as pltpu


# ----------------------------------------------------------------------------
# Fused decoder kernel: attention cell + LSTMCell recurrence + generator epilogue
# ----------------------------------------------------------------------------
def _decoder_kernel(src_ref, wi2h_ref, w_h_ref, b_h_ref, wscore_ref,
                    wih_ctx_ref, wih_emb_ref, wgen_ref, bgen_ref, emb_ref,
                    probs_ref,
                    sf_sc, hid_sc):
    Bt, L, Dp = src_ref.shape
    T = emb_ref.shape[0]
    Hp = w_h_ref.shape[0]
    Cp = probs_ref.shape[-1]
    f32, bf16 = jnp.float32, jnp.bfloat16

    # src_features = i2h(src): computed once per batch block, kept in VMEM scratch.
    sf_sc[...] = jnp.dot(src_ref[...].reshape(Bt * L, Dp), wi2h_ref[...],
                         preferred_element_type=f32).reshape(Bt, L, Hp)

    def step(t, carry):
        h, c = carry                                            # [Bt, Hp] f32 each

        # Fused h-matmul: [h2h | W_hh] and [b_h2h | (b_ih + b_hh)] in one shot.
        hout = jnp.dot(h.astype(bf16), w_h_ref[...],
                       preferred_element_type=f32) + b_h_ref[...]   # [Bt, 5Hp]
        proj = hout[:, :Hp]                                     # h2h(h)
        gate_h = hout[:, Hp:]                                   # h @ W_hh + biases

        # attention_logit = score(tanh(src_features + proj)); softmax over L
        e = jnp.tanh(sf_sc[...] + proj[:, None, :])             # [Bt, L, Hp]
        logit = jnp.sum(e * wscore_ref[...], axis=-1)           # [Bt, L]
        mx = jnp.max(logit, axis=-1, keepdims=True)
        p = jnp.exp(logit - mx)
        alpha = p * pl.reciprocal(jnp.sum(p, axis=-1, keepdims=True), approx=True)

        # context = bmm(alpha^T, src)
        # TODO(synk): for large L*D switch to an MXU einsum ('bql,bld->bqd') instead
        # of this VPU broadcast-multiply + sublane reduce.
        context = jnp.sum(alpha[:, :, None] * src_ref[...].astype(f32), axis=1)

        # LSTMCell gates on concat([context, emb]) (concat avoided by split W_ih).
        gates = (jnp.dot(context.astype(bf16), wih_ctx_ref[...],
                         preferred_element_type=f32)
                 + jnp.dot(emb_ref[t], wih_emb_ref[...],
                           preferred_element_type=f32)
                 + gate_h)                                      # [Bt, 4Hp]

        i_g = jax.nn.sigmoid(gates[:, 0 * Hp:1 * Hp])
        f_g = jax.nn.sigmoid(gates[:, 1 * Hp:2 * Hp])
        g_g = jnp.tanh(gates[:, 2 * Hp:3 * Hp])
        o_g = jax.nn.sigmoid(gates[:, 3 * Hp:4 * Hp])

        c_new = f_g * c + i_g * g_g
        h_new = o_g * jnp.tanh(c_new)

        hid_sc[t] = h_new                                       # stash for generator
        return (h_new, c_new)

    z = jnp.zeros((Bt, Hp), f32)
    lax.fori_loop(0, T, step, (z, z))

    # Generator hoisted out of the recurrence: one [T*Bt, Hp] x [Hp, Cp] matmul.
    hid = hid_sc[...].reshape(T * Bt, Hp).astype(bf16)
    logits = jnp.dot(hid, wgen_ref[...], preferred_element_type=f32) + bgen_ref[...]
    probs_ref[...] = logits.reshape(T, Bt, Cp)


# ----------------------------------------------------------------------------
# Wrapper: padding / weight layout + a single fused pallas_call
# ----------------------------------------------------------------------------
def _rup(x, m):
    return (x + m - 1) // m * m


def attention_decoder_forward(src, text, params, batch_max_length=50):
    """Teacher-forcing forward (is_train=True, teacher_forcing_ratio=1.0).

    src:  [B, L, src_dim] f32 encoder features
    text: [B, batch_max_length] int32 token ids (text[:, 0] = START)
    returns probs: [B, num_steps, num_classes]
    """
    B, L, D = src.shape
    H = params["h2h_w"].shape[0]
    E = params["emb_table"].shape[1]
    C = params["gen_w"].shape[1]
    T = batch_max_length - 1

    f32, bf16 = jnp.float32, jnp.bfloat16
    LANE, SUB = 128, 8
    Dp, Ep, Hp, Cp = _rup(D, LANE), _rup(E, LANE), _rup(H, LANE), _rup(C, LANE)
    Bp = _rup(B, SUB)

    # Batch-block grid: split into 2 parallel blocks (v7x's 2 TensorCores) when the
    # padded batch allows clean bf16-tile-aligned halves; otherwise a single block.
    if Bp >= 32 and Bp % 32 == 0:
        Bt = Bp // 2
    else:
        Bt = Bp
    num_bb = Bp // Bt

    def pad2(w, r, c):
        return jnp.pad(w, ((0, r - w.shape[0]), (0, c - w.shape[1])))

    def pad1(v, n):
        return jnp.pad(v, (0, n - v.shape[0]))

    def pad_gate_cols(w):    # [in, 4H] -> [in, 4Hp], each (i,f,g,o) block padded to Hp
        blocks = [jnp.pad(w[:, k * H:(k + 1) * H], ((0, 0), (0, Hp - H)))
                  for k in range(4)]
        return jnp.concatenate(blocks, axis=1)

    def pad_gate_vec(v):     # [4H] -> [4Hp]
        blocks = [jnp.pad(v[k * H:(k + 1) * H], (0, Hp - H)) for k in range(4)]
        return jnp.concatenate(blocks)

    # TODO(synk): nn.Embedding row-gather is done in plain JAX (jnp.take); a Pallas
    # scalar-prefetch gather is overkill at these sizes.
    emb = jnp.take(params["emb_table"], text[:, :T], axis=0)          # [B, T, E]
    emb = jnp.transpose(emb, (1, 0, 2))                               # [T, B, E]
    emb = jnp.pad(emb, ((0, 0), (0, Bp - B), (0, Ep - E))).astype(bf16)

    src_p = jnp.pad(src.astype(f32),
                    ((0, Bp - B), (0, 0), (0, Dp - D))).astype(bf16)  # [Bp, L, Dp]

    wi2h = pad2(params["i2h_w"], Dp, Hp).astype(bf16)                 # [Dp, Hp]

    wh2h = pad2(params["h2h_w"], Hp, Hp)                              # [Hp, Hp]
    whh = pad_gate_cols(params["lstm_w_hh"])                          # [H,  4Hp]
    whh = jnp.pad(whh, ((0, Hp - H), (0, 0)))                         # [Hp, 4Hp]
    w_h = jnp.concatenate([wh2h, whh], axis=1).astype(bf16)           # [Hp, 5Hp]

    bh2h = pad1(params["h2h_b"], Hp)
    bgates = pad_gate_vec(params["lstm_b_ih"] + params["lstm_b_hh"])
    b_h = jnp.concatenate([bh2h, bgates]).reshape(1, 5 * Hp).astype(f32)

    wscore = pad1(params["score_w"], Hp).reshape(1, 1, Hp).astype(f32)

    wih = params["lstm_w_ih"]                                         # [D+E, 4H]
    wih_ctx = jnp.pad(pad_gate_cols(wih[:D]), ((0, Dp - D), (0, 0))).astype(bf16)
    wih_emb = jnp.pad(pad_gate_cols(wih[D:]), ((0, Ep - E), (0, 0))).astype(bf16)

    wgen = pad2(params["gen_w"], Hp, Cp).astype(bf16)                 # [Hp, Cp]
    bgen = pad1(params["gen_b"], Cp).reshape(1, Cp).astype(f32)

    # Generation-dependent VMEM limit: 3/4 of physical capacity, capped at 100 MiB.
    try:
        vmem_cap = int(pltpu.get_tpu_info().vmem_capacity_bytes)
    except Exception:
        vmem_cap = 64 * 1024 * 1024
    vmem_limit = max(32 * 1024 * 1024, min(vmem_cap * 3 // 4, 100 * 1024 * 1024))

    probs_pad = pl.pallas_call(
        _decoder_kernel,
        out_shape=jax.ShapeDtypeStruct((T, Bp, Cp), f32),
        grid=(num_bb,),
        in_specs=[
            pl.BlockSpec((Bt, L, Dp), lambda b: (b, 0, 0)),      # src (bf16)
            pl.BlockSpec((Dp, Hp), lambda b: (0, 0)),            # i2h weight
            pl.BlockSpec((Hp, 5 * Hp), lambda b: (0, 0)),        # fused [h2h | W_hh]
            pl.BlockSpec((1, 5 * Hp), lambda b: (0, 0)),         # fused h biases
            pl.BlockSpec((1, 1, Hp), lambda b: (0, 0, 0)),       # score weight
            pl.BlockSpec((Dp, 4 * Hp), lambda b: (0, 0)),        # W_ih (context part)
            pl.BlockSpec((Ep, 4 * Hp), lambda b: (0, 0)),        # W_ih (embedding part)
            pl.BlockSpec((Hp, Cp), lambda b: (0, 0)),            # generator weight
            pl.BlockSpec((1, Cp), lambda b: (0, 0)),             # generator bias
            pl.BlockSpec((T, Bt, Ep), lambda b: (0, b, 0)),      # all embedded tokens
        ],
        out_specs=pl.BlockSpec((T, Bt, Cp), lambda b: (0, b, 0)),
        scratch_shapes=[
            pltpu.VMEM((Bt, L, Hp), f32),     # src_features = i2h(src)
            pltpu.VMEM((T, Bt, Hp), f32),     # per-step hidden states
        ],
        compiler_params=pltpu.CompilerParams(
            dimension_semantics=("parallel",),    # batch blocks are independent
            vmem_limit_bytes=vmem_limit,
        ),
    )(src_p, wi2h, w_h, b_h, wscore, wih_ctx, wih_emb, wgen, bgen, emb)

    # [T, Bp, Cp] -> [B, T, C]
    return jnp.transpose(probs_pad[:, :B, :C], (1, 0, 2))


# ----------------------------------------------------------------------------
# Parameter init (layouts are transposes of the torch nn.Linear / nn.LSTMCell weights)
# ----------------------------------------------------------------------------
def init_params(key, num_classes, src_dim, embedding_dim, hidden_dim):
    H, D, E, C = hidden_dim, src_dim, embedding_dim, num_classes
    ks = jax.random.split(key, 10)

    def lin(k, fan_in, shape):
        return (jax.random.uniform(k, shape, jnp.float32, -1.0, 1.0)
                / jnp.sqrt(jnp.float32(fan_in)))

    return {
        "emb_table": jax.random.normal(ks[0], (C + 1, E), jnp.float32),
        "i2h_w": lin(ks[1], D, (D, H)),                  # torch i2h.weight.T
        "h2h_w": lin(ks[2], H, (H, H)),                  # torch h2h.weight.T
        "h2h_b": lin(ks[3], H, (H,)),
        "score_w": lin(ks[4], H, (H,)),                  # torch score.weight[0]
        "lstm_w_ih": lin(ks[5], D + E, (D + E, 4 * H)),  # torch weight_ih.T (i,f,g,o)
        "lstm_w_hh": lin(ks[6], H, (H, 4 * H)),          # torch weight_hh.T
        "lstm_b_ih": lin(ks[7], H, (4 * H,)),
        "lstm_b_hh": lin(ks[8], H, (4 * H,)),
        "gen_w": lin(ks[9], H, (H, C)),                  # torch generator.weight.T
        "gen_b": jnp.zeros((C,), jnp.float32),
    }


if __name__ == "__main__":
    key = jax.random.PRNGKey(0)
    k_params, k_src, k_text = jax.random.split(key, 3)

    B, L = 2, 8                       # batch, encoder sequence length
    src_dim, embedding_dim, hidden_dim = 32, 32, 32
    num_classes = 16
    batch_max_length = 6              # -> 5 decode steps

    params = init_params(k_params, num_classes, src_dim, embedding_dim, hidden_dim)
    src = jax.random.normal(k_src, (B, L, src_dim), jnp.float32)
    text = jax.random.randint(k_text, (B, batch_max_length), 0, num_classes + 1,
                              jnp.int32)

    probs = attention_decoder_forward(src, text, params,
                                      batch_max_length=batch_max_length)
    probs = jax.block_until_ready(probs)

    assert probs.shape == (B, batch_max_length - 1, num_classes), probs.shape
    assert bool(jnp.all(jnp.isfinite(probs)))
    print("KERNEL_OK")
</pallas_src>

<mosaic_0001>
module attributes {stable_mosaic.version = 11 : i64} {
  func.func @_decoder_kernel(%arg0: i32, %arg1: memref<8x8x128xbf16, #tpu.memory_space<vmem>>, %arg2: memref<128x128xbf16, #tpu.memory_space<vmem>>, %arg3: memref<128x640xbf16, #tpu.memory_space<vmem>>, %arg4: memref<1x640xf32, #tpu.memory_space<vmem>>, %arg5: memref<1x1x128xf32, #tpu.memory_space<vmem>>, %arg6: memref<128x512xbf16, #tpu.memory_space<vmem>>, %arg7: memref<128x512xbf16, #tpu.memory_space<vmem>>, %arg8: memref<128x128xbf16, #tpu.memory_space<vmem>>, %arg9: memref<1x128xf32, #tpu.memory_space<vmem>>, %arg10: memref<5x8x128xbf16, #tpu.memory_space<vmem>>, %arg11: memref<5x8x128xf32, #tpu.memory_space<vmem>>, %arg12: memref<8x8x128xf32, #tpu.memory_space<vmem>>, %arg13: memref<5x8x128xf32, #tpu.memory_space<vmem>>) attributes {dimension_semantics = [#tpu.dimension_semantics<parallel>], iteration_bounds = array<i64: 1>, scalar_prefetch = 0 : i64, scratch_operands = 2 : i64, tpu.core_type = #tpu.core_type<tc>, window_params = [{transform_indices = @transform_0, window_bounds = array<i64: 8, 8, 128>}, {pipeline_mode = #tpu.pipeline_mode<synchronous>, transform_indices = @transform_1, window_bounds = array<i64: 128, 128>}, {pipeline_mode = #tpu.pipeline_mode<synchronous>, transform_indices = @transform_2, window_bounds = array<i64: 128, 640>}, {pipeline_mode = #tpu.pipeline_mode<synchronous>, transform_indices = @transform_3, window_bounds = array<i64: 1, 640>}, {pipeline_mode = #tpu.pipeline_mode<synchronous>, transform_indices = @transform_4, window_bounds = array<i64: 1, 1, 128>}, {pipeline_mode = #tpu.pipeline_mode<synchronous>, transform_indices = @transform_5, window_bounds = array<i64: 128, 512>}, {pipeline_mode = #tpu.pipeline_mode<synchronous>, transform_indices = @transform_6, window_bounds = array<i64: 128, 512>}, {pipeline_mode = #tpu.pipeline_mode<synchronous>, transform_indices = @transform_7, window_bounds = array<i64: 128, 128>}, {pipeline_mode = #tpu.pipeline_mode<synchronous>, transform_indices = @transform_8, window_bounds = array<i64: 1, 128>}, {transform_indices = @transform_9, window_bounds = array<i64: 5, 8, 128>}, {transform_indices = @transform_10, window_bounds = array<i64: 5, 8, 128>}]} {
    %c0 = arith.constant 0 : index
    %c0_0 = arith.constant 0 : index
    %c0_1 = arith.constant 0 : index
    %0 = vector.load %arg1[%c0, %c0_0, %c0_1] : memref<8x8x128xbf16, #tpu.memory_space<vmem>>, vector<8x8x128xbf16>
    %1 = vector.shape_cast %0 : vector<8x8x128xbf16> to vector<64x128xbf16>
    %c0_2 = arith.constant 0 : index
    %c0_3 = arith.constant 0 : index
    %2 = vector.load %arg2[%c0_2, %c0_3] : memref<128x128xbf16, #tpu.memory_space<vmem>>, vector<128x128xbf16>
    %cst = arith.constant dense<0.000000e+00> : vector<64x128xf32>
    %3 = tpu.matmul %1, %2, %cst {dimension_numbers = #tpu.dot_dimension_numbers<[1], [0], [0], [1], [0, 0, 1, 1], [], []>} : vector<64x128xbf16>, vector<128x128xbf16>, vector<64x128xf32> -> vector<64x128xf32>
    %4 = vector.shape_cast %3 : vector<64x128xf32> to vector<8x8x128xf32>
    %c0_4 = arith.constant 0 : index
    %c0_5 = arith.constant 0 : index
    %c0_6 = arith.constant 0 : index
    %5 = vector.load %arg12[%c0_4, %c0_5, %c0_6] : memref<8x8x128xf32, #tpu.memory_space<vmem>>, vector<8x8x128xf32>
    tpu.vector_store %arg12[%c0_4, %c0_5, %c0_6], %4 {strides = array<i32>} : memref<8x8x128xf32, #tpu.memory_space<vmem>>, vector<8x8x128xf32>,
    %cst_7 = arith.constant 0.000000e+00 : f32
    %6 = vector.broadcast %cst_7 : f32 to vector<8x128xf32>
    %c0_i32 = arith.constant 0 : i32
    %c5_i32 = arith.constant 5 : i32
    %7 = arith.addi %c0_i32, %c5_i32 : i32
    %c1_i32 = arith.constant 1 : i32
    %8:2 = scf.for %arg14 = %c0_i32 to %7 step %c1_i32 iter_args(%arg15 = %6, %arg16 = %6) -> (vector<8x128xf32>, vector<8x128xf32>)  : i32 {
      %19 = arith.truncf %arg15 : vector<8x128xf32> to vector<8x128xbf16>
      %c0_20 = arith.constant 0 : index
      %c0_21 = arith.constant 0 : index
      %20 = vector.load %arg3[%c0_20, %c0_21] : memref<128x640xbf16, #tpu.memory_space<vmem>>, vector<128x640xbf16>
      %cst_22 = arith.constant dense<0.000000e+00> : vector<8x640xf32>
      %21 = tpu.matmul %19, %20, %cst_22 {dimension_numbers = #tpu.dot_dimension_numbers<[1], [0], [0], [1], [0, 0, 1, 1], [], []>} : vector<8x128xbf16>, vector<128x640xbf16>, vector<8x640xf32> -> vector<8x640xf32>
      %c0_23 = arith.constant 0 : index
      %c0_24 = arith.constant 0 : index
      %22 = vector.load %arg4[%c0_23, %c0_24] : memref<1x640xf32, #tpu.memory_space<vmem>>, vector<1x640xf32>
      %23 = vector.broadcast %22 : vector<1x640xf32> to vector<8x640xf32>
      %24 = arith.addf %21, %23 : vector<8x640xf32>
      %25 = vector.extract_strided_slice %24 {offsets = [0, 0], sizes = [8, 128], strides = [1, 1]} : vector<8x640xf32> to vector<8x128xf32>
      %26 = vector.extract_strided_slice %24 {offsets = [0, 128], sizes = [8, 512], strides = [1, 1]} : vector<8x640xf32> to vector<8x512xf32>
      %c0_25 = arith.constant 0 : index
      %c0_26 = arith.constant 0 : index
      %c0_27 = arith.constant 0 : index
      %27 = vector.load %arg12[%c0_25, %c0_26, %c0_27] : memref<8x8x128xf32, #tpu.memory_space<vmem>>, vector<8x8x128xf32>
      %28 = vector.shape_cast %25 : vector<8x128xf32> to vector<8x1x128xf32>
      %29 = vector.broadcast %28 : vector<8x1x128xf32> to vector<8x8x128xf32>
      %30 = arith.addf %27, %29 : vector<8x8x128xf32>
      %31 = math.tanh %30 : vector<8x8x128xf32>
      %c0_28 = arith.constant 0 : index
      %c0_29 = arith.constant 0 : index
      %c0_30 = arith.constant 0 : index
      %32 = vector.load %arg5[%c0_28, %c0_29, %c0_30] : memref<1x1x128xf32, #tpu.memory_space<vmem>>, vector<1x1x128xf32>
      %33 = vector.broadcast %32 : vector<1x1x128xf32> to vector<8x8x128xf32>
      %34 = arith.mulf %31, %33 : vector<8x8x128xf32>
      %cst_31 = arith.constant dense<0.000000e+00> : vector<8x8xf32>
      %35 = vector.multi_reduction <add>, %34, %cst_31 [2] : vector<8x8x128xf32> to vector<8x8xf32>
      %cst_32 = arith.constant dense<0xFF800000> : vector<8xf32>
      %36 = vector.multi_reduction <maximumf>, %35, %cst_32 [1] : vector<8x8xf32> to vector<8xf32>
      %37 = vector.shape_cast %36 : vector<8xf32> to vector<8x1xf32>
      %38 = vector.broadcast %37 : vector<8x1xf32> to vector<8x8xf32>
      %39 = arith.subf %35, %38 : vector<8x8xf32>
      %40 = math.exp %39 : vector<8x8xf32>
      %cst_33 = arith.constant dense<0.000000e+00> : vector<8xf32>
      %41 = vector.multi_reduction <add>, %40, %cst_33 [1] : vector<8x8xf32> to vector<8xf32>
      %42 = vector.shape_cast %41 : vector<8xf32> to vector<8x1xf32>
      %43 = tpu.reciprocal %42 {approx = true} : vector<8x1xf32> -> vector<8x1xf32>
      %44 = vector.broadcast %43 : vector<8x1xf32> to vector<8x8xf32>
      %45 = arith.mulf %40, %44 : vector<8x8xf32>
      %46 = vector.shape_cast %45 : vector<8x8xf32> to vector<8x8x1xf32>
      %c0_34 = arith.constant 0 : index
      %c0_35 = arith.constant 0 : index
      %c0_36 = arith.constant 0 : index
      %47 = vector.load %arg1[%c0_34, %c0_35, %c0_36] : memref<8x8x128xbf16, #tpu.memory_space<vmem>>, vector<8x8x128xbf16>
      %48 = arith.extf %47 : vector<8x8x128xbf16> to vector<8x8x128xf32>
      %49 = vector.broadcast %46 : vector<8x8x1xf32> to vector<8x8x128xf32>
      %50 = arith.mulf %49, %48 : vector<8x8x128xf32>
      %cst_37 = arith.constant dense<0.000000e+00> : vector<8x128xf32>
      %51 = vector.multi_reduction <add>, %50, %cst_37 [1] : vector<8x8x128xf32> to vector<8x128xf32>
      %52 = arith.truncf %51 : vector<8x128xf32> to vector<8x128xbf16>
      %c0_38 = arith.constant 0 : index
      %c0_39 = arith.constant 0 : index
      %53 = vector.load %arg6[%c0_38, %c0_39] : memref<128x512xbf16, #tpu.memory_space<vmem>>, vector<128x512xbf16>
      %cst_40 = arith.constant dense<0.000000e+00> : vector<8x512xf32>
      %54 = tpu.matmul %52, %53, %cst_40 {dimension_numbers = #tpu.dot_dimension_numbers<[1], [0], [0], [1], [0, 0, 1, 1], [], []>} : vector<8x128xbf16>, vector<128x512xbf16>, vector<8x512xf32> -> vector<8x512xf32>
      %55 = arith.index_cast %arg14 : i32 to index
      %c0_41 = arith.constant 0 : index
      %c0_42 = arith.constant 0 : index
      %56 = vector.load %arg10[%55, %c0_41, %c0_42] : memref<5x8x128xbf16, #tpu.memory_space<vmem>>, vector<1x8x128xbf16>
      %57 = vector.shape_cast %56 : vector<1x8x128xbf16> to vector<8x128xbf16>
      %c0_43 = arith.constant 0 : index
      %c0_44 = arith.constant 0 : index
      %58 = vector.load %arg7[%c0_43, %c0_44] : memref<128x512xbf16, #tpu.memory_space<vmem>>, vector<128x512xbf16>
      %cst_45 = arith.constant dense<0.000000e+00> : vector<8x512xf32>
      %59 = tpu.matmul %57, %58, %cst_45 {dimension_numbers = #tpu.dot_dimension_numbers<[1], [0], [0], [1], [0, 0, 1, 1], [], []>} : vector<8x128xbf16>, vector<128x512xbf16>, vector<8x512xf32> -> vector<8x512xf32>
      %60 = arith.addf %54, %59 : vector<8x512xf32>
      %61 = arith.addf %60, %26 : vector<8x512xf32>
      %62 = vector.extract_strided_slice %61 {offsets = [0, 0], sizes = [8, 128], strides = [1, 1]} : vector<8x512xf32> to vector<8x128xf32>
      %63 = arith.negf %62 : vector<8x128xf32>
      %64 = math.exp %63 : vector<8x128xf32>
      %cst_46 = arith.constant 1.000000e+00 : f32
      %65 = vector.broadcast %cst_46 : f32 to vector<8x128xf32>
      %66 = arith.addf %65, %64 : vector<8x128xf32>
      %67 = arith.divf %65, %66 : vector<8x128xf32>
      %68 = vector.extract_strided_slice %61 {offsets = [0, 128], sizes = [8, 128], strides = [1, 1]} : vector<8x512xf32> to vector<8x128xf32>
      %69 = arith.negf %68 : vector<8x128xf32>
      %70 = math.exp %69 : vector<8x128xf32>
      %cst_47 = arith.constant 1.000000e+00 : f32
      %71 = vector.broadcast %cst_47 : f32 to vector<8x128xf32>
      %72 = arith.addf %71, %70 : vector<8x128xf32>
      %73 = arith.divf %71, %72 : vector<8x128xf32>
      %74 = vector.extract_strided_slice %61 {offsets = [0, 256], sizes = [8, 128], strides = [1, 1]} : vector<8x512xf32> to vector<8x128xf32>
      %75 = math.tanh %74 : vector<8x128xf32>
      %76 = vector.extract_strided_slice %61 {offsets = [0, 384], sizes = [8, 128], strides = [1, 1]} : vector<8x512xf32> to vector<8x128xf32>
      %77 = arith.negf %76 : vector<8x128xf32>
      %78 = math.exp %77 : vector<8x128xf32>
      %cst_48 = arith.constant 1.000000e+00 : f32
      %79 = vector.broadcast %cst_48 : f32 to vector<8x128xf32>
      %80 = arith.addf %79, %78 : vector<8x128xf32>
      %81 = arith.divf %79, %80 : vector<8x128xf32>
      %82 = arith.mulf %73, %arg16 : vector<8x128xf32>
      %83 = arith.mulf %67, %75 : vector<8x128xf32>
      %84 = arith.addf %82, %83 : vector<8x128xf32>
      %85 = math.tanh %84 : vector<8x128xf32>
      %86 = arith.mulf %81, %85 : vector<8x128xf32>
      %87 = arith.index_cast %arg14 : i32 to index
      %c0_49 = arith.constant 0 : index
      %c0_50 = arith.constant 0 : index
      %88 = vector.load %arg13[%87, %c0_49, %c0_50] : memref<5x8x128xf32, #tpu.memory_space<vmem>>, vector<1x8x128xf32>
      %89 = vector.shape_cast %88 : vector<1x8x128xf32> to vector<8x128xf32>
      %90 = vector.shape_cast %86 : vector<8x128xf32> to vector<1x8x128xf32>
      tpu.vector_store %arg13[%87, %c0_49, %c0_50], %90 {strides = array<i32>} : memref<5x8x128xf32, #tpu.memory_space<vmem>>, vector<1x8x128xf32>,
      scf.yield %86, %84 : vector<8x128xf32>, vector<8x128xf32>
    }
    %c5_i32_8 = arith.constant 5 : i32
    %c0_9 = arith.constant 0 : index
    %c0_10 = arith.constant 0 : index
    %c0_11 = arith.constant 0 : index
    %9 = vector.load %arg13[%c0_9, %c0_10, %c0_11] : memref<5x8x128xf32, #tpu.memory_space<vmem>>, vector<5x8x128xf32>
    %10 = vector.shape_cast %9 : vector<5x8x128xf32> to vector<40x128xf32>
    %11 = arith.truncf %10 : vector<40x128xf32> to vector<40x128xbf16>
    %c0_12 = arith.constant 0 : index
    %c0_13 = arith.constant 0 : index
    %12 = vector.load %arg8[%c0_12, %c0_13] : memref<128x128xbf16, #tpu.memory_space<vmem>>, vector<128x128xbf16>
    %cst_14 = arith.constant dense<0.000000e+00> : vector<40x128xf32>
    %13 = tpu.matmul %11, %12, %cst_14 {dimension_numbers = #tpu.dot_dimension_numbers<[1], [0], [0], [1], [0, 0, 1, 1], [], []>} : vector<40x128xbf16>, vector<128x128xbf16>, vector<40x128xf32> -> vector<40x128xf32>
    %c0_15 = arith.constant 0 : index
    %c0_16 = arith.constant 0 : index
    %14 = vector.load %arg9[%c0_15, %c0_16] : memref<1x128xf32, #tpu.memory_space<vmem>>, vector<1x128xf32>
    %15 = vector.broadcast %14 : vector<1x128xf32> to vector<40x128xf32>
    %16 = arith.addf %13, %15 : vector<40x128xf32>
    %17 = vector.shape_cast %16 : vector<40x128xf32> to vector<5x8x128xf32>
    %c0_17 = arith.constant 0 : index
    %c0_18 = arith.constant 0 : index
    %c0_19 = arith.constant 0 : index
    %18 = vector.load %arg11[%c0_17, %c0_18, %c0_19] : memref<5x8x128xf32, #tpu.memory_space<vmem>>, vector<5x8x128xf32>
    tpu.vector_store %arg11[%c0_17, %c0_18, %c0_19], %17 {strides = array<i32>} : memref<5x8x128xf32, #tpu.memory_space<vmem>>, vector<5x8x128xf32>,
    return
  }
  func.func @transform_0(%arg0: i32) -> (i32, i32, i32) {
    %c0_i32 = arith.constant 0 : i32
    %c0_i32_0 = arith.constant 0 : i32
    %c0_i32_1 = arith.constant 0 : i32
    return %arg0, %c0_i32, %c0_i32_0 : i32, i32, i32
  }
  func.func @transform_1(%arg0: i32) -> (i32, i32) {
    %c0_i32 = arith.constant 0 : i32
    %c0_i32_0 = arith.constant 0 : i32
    %c0_i32_1 = arith.constant 0 : i32
    return %c0_i32, %c0_i32_0 : i32, i32
  }
  func.func @transform_2(%arg0: i32) -> (i32, i32) {
    %c0_i32 = arith.constant 0 : i32
    %c0_i32_0 = arith.constant 0 : i32
    %c0_i32_1 = arith.constant 0 : i32
    return %c0_i32, %c0_i32_0 : i32, i32
  }
  func.func @transform_3(%arg0: i32) -> (i32, i32) {
    %c0_i32 = arith.constant 0 : i32
    %c0_i32_0 = arith.constant 0 : i32
    %c0_i32_1 = arith.constant 0 : i32
    return %c0_i32, %c0_i32_0 : i32, i32
  }
  func.func @transform_4(%arg0: i32) -> (i32, i32, i32) {
    %c0_i32 = arith.constant 0 : i32
    %c0_i32_0 = arith.constant 0 : i32
    %c0_i32_1 = arith.constant 0 : i32
    %c0_i32_2 = arith.constant 0 : i32
    return %c0_i32, %c0_i32_0, %c0_i32_1 : i32, i32, i32
  }
  func.func @transform_5(%arg0: i32) -> (i32, i32) {
    %c0_i32 = arith.constant 0 : i32
    %c0_i32_0 = arith.constant 0 : i32
    %c0_i32_1 = arith.constant 0 : i32
    return %c0_i32, %c0_i32_0 : i32, i32
  }
  func.func @transform_6(%arg0: i32) -> (i32, i32) {
    %c0_i32 = arith.constant 0 : i32
    %c0_i32_0 = arith.constant 0 : i32
    %c0_i32_1 = arith.constant 0 : i32
    return %c0_i32, %c0_i32_0 : i32, i32
  }
  func.func @transform_7(%arg0: i32) -> (i32, i32) {
    %c0_i32 = arith.constant 0 : i32
    %c0_i32_0 = arith.constant 0 : i32
    %c0_i32_1 = arith.constant 0 : i32
    return %c0_i32, %c0_i32_0 : i32, i32
  }
  func.func @transform_8(%arg0: i32) -> (i32, i32) {
    %c0_i32 = arith.constant 0 : i32
    %c0_i32_0 = arith.constant 0 : i32
    %c0_i32_1 = arith.constant 0 : i32
    return %c0_i32, %c0_i32_0 : i32, i32
  }
  func.func @transform_9(%arg0: i32) -> (i32, i32, i32) {
    %c0_i32 = arith.constant 0 : i32
    %c0_i32_0 = arith.constant 0 : i32
    %c0_i32_1 = arith.constant 0 : i32
    return %c0_i32, %arg0, %c0_i32_0 : i32, i32, i32
  }
  func.func @transform_10(%arg0: i32) -> (i32, i32, i32) {
    %c0_i32 = arith.constant 0 : i32
    %c0_i32_0 = arith.constant 0 : i32
    %c0_i32_1 = arith.constant 0 : i32
    return %c0_i32, %arg0, %c0_i32_0 : i32, i32, i32
  }
}

</mosaic_0001>

<bundles_post_ra>
// kernel: tpu_custom_call.1
= control target key start
LH: loop header
LB: loop body
LE: loop exit
PB: predicated region body
PF: predicated region fallthrough
CT: control target
= control target key end

     0   :  { %15 = vsyncpa [#allocation5], 0  ;;  %s3146_s0 = inlined_call_operand.hbm [shape: bf16[8,8,128], index: 0, kind: input, shape index: {}]   ;;  %s3147_s1 = inlined_call_operand.hbm [shape: bf16[128,128], index: 1, kind: input, shape index: {}]   ;;  %s3148_s2 = inlined_call_operand.hbm [shape: bf16[128,640], index: 2, kind: input, shape index: {}]   ;;  %s3149_s3 = inlined_call_operand.vmem [shape: f32[1,640], index: 3, kind: input, shape index: {}]   ;;  %s3150_s4 = inlined_call_operand.vmem [shape: f32[1,1,128], index: 4, kind: input, shape index: {}]   ;;  %s3151_s5 = inlined_call_operand.hbm [shape: bf16[128,512], index: 5, kind: input, shape index: {}]   ;;  %s3152_s6 = inlined_call_operand.hbm [shape: bf16[128,512], index: 6, kind: input, shape index: {}]   ;;  %s3153_s7 = inlined_call_operand.hbm [shape: bf16[128,128], index: 7, kind: input, shape index: {}]   ;;  %s3154_s8 = inlined_call_operand.vmem [shape: f32[1,128], index: 8, kind: input, shape index: {}]   ;;  %s3155_s9 = inlined_call_operand.vmem [shape: bf16[5,8,128], index: 9, kind: input, shape index: {}]   ;;  %s3156_s10 = inlined_call_operand.hbm [shape: f32[5,8,128], index: 10, kind: output, shape index: {}]  }
   0x1   :  { %16 = vsyncpa [#allocation8], 0 }
   0x2   :  { %17 = vsyncpa [#allocation11], 0 }
   0x3   :  { %18 = vsyncpa [#allocation14], 0 }
   0x4   :  { %19 = vsyncpa [#allocation6], 0  ;;  %s2752_s13 = smov [#allocation7]   ;;  %s2753_s15 = smov [#allocation10]  }
   0x5   :  { %s37_s14 = sshll.u32 %s2752_s13, 4  ;;  %s65_s16 = sshll.u32 %s2753_s15, 4  ;;  %s38_s14 = int_to_ptr.vmem [resolvable:$true] %s37_s14  ;;  %s2828_s16 = int_to_ptr.vmem [resolvable:$true] %s65_s16 }
   0x6   :  { %s2564_s19 = scalar_lea.hbm %s3147_s1, 1024 }
   0x7   :  { %p2565_p0 = scmp.ne.s32.totalorder %s3147_s1, %s2564_s19  ;;  %p2568_p1 = scmp.lt.u32.totalorder %s2564_s19, %s3147_s1 }
   0x9   :  { %p2570_p2 = pnand %p2568_p1, %p2565_p0 }
   0xb   :  { %2573 = shalt.err (!%p2570_p2)
}
   0xc   :  { %s2574_s24 = scalar_lea.vmem %s38_s14, 1024  ;;  %p2579_p4 = scmp.lt.s32.totalorder %s38_s14, %s38_s14 }
   0xd   :  { %p2575_p3 = scmp.ne.s32.totalorder %s38_s14, %s2574_s24  ;;  %p2580_p5 = scmp.lt.s32.totalorder %s2574_s24, %s2574_s24 }
   0xf   :  { %p2581_p6 = por %p2580_p5, %p2579_p4 }
  0x11   :  { %p2582_p7 = pnand %p2581_p6, %p2575_p3 }
  0x13   :  { %2585 = shalt.err (!%p2582_p7)
}
  0x14   :  { %s2754_s25 = smov 64   ;;  %s2755_s26 = smov 4  }
  0x15   :  { %43 = dma.hbm_to_vmem [thread:$0]  %s3147_s1, 1024, %s38_s14, [#allocation8], %s2754_s25, %s2754_s25, %s2755_s26  }
  0x16   :  { %s2586_s11 = scalar_lea.hbm %s3151_s5, 4096 }
  0x17   :  { %p2587_p8 = scmp.ne.s32.totalorder %s3151_s5, %s2586_s11  ;;  %p2590_p9 = scmp.lt.u32.totalorder %s2586_s11, %s3151_s5 }
  0x19   :  { %p2592_p10 = pnand %p2590_p9, %p2587_p8 }
  0x1b   :  { %2595 = shalt.err (!%p2592_p10)
}
  0x1c   :  { %s2596_s18 = scalar_lea.vmem %s2828_s16, 4096  ;;  %p2601_p12 = scmp.lt.s32.totalorder %s2828_s16, %s2828_s16 }
  0x1d   :  { %p2597_p11 = scmp.ne.s32.totalorder %s2828_s16, %s2596_s18  ;;  %p2602_p13 = scmp.lt.s32.totalorder %s2596_s18, %s2596_s18 }
  0x1f   :  { %p2603_p0 = por %p2602_p13, %p2601_p12 }
  0x21   :  { %p2604_p1 = pnand %p2603_p0, %p2597_p11 }
  0x23   :  { %2607 = shalt.err (!%p2604_p1)
}
  0x24   :  { %s2756_s1 = smov 256   ;;  %s2757_s14 = smov 16  }
  0x25   :  { %71 = dma.hbm_to_vmem [thread:$0]  %s3151_s5, 4096, %s2828_s16, [#allocation11], %s2756_s1, %s2756_s1, %s2757_s14  }
  0x26   :  { %s2758_s21 = smov [#allocation4]   ;;  %s2759_s23 = smov [#allocation9]  }
  0x27   :  { %s25_s22 = sshll.u32 %s2758_s21, 4  ;;  %s49_s24 = sshll.u32 %s2759_s23, 4  ;;  %s26_s22 = int_to_ptr.vmem [resolvable:$true] %s25_s22  ;;  %s2865_s24 = int_to_ptr.vmem [resolvable:$true] %s49_s24 }
  0x28   :  { %s2608_s29 = scalar_lea.hbm %s3146_s0, 512 }
  0x29   :  { %p2609_p2 = scmp.ne.s32.totalorder %s3146_s0, %s2608_s29  ;;  %p2612_p3 = scmp.lt.u32.totalorder %s2608_s29, %s3146_s0 }
  0x2b   :  { %p2614_p4 = pnand %p2612_p3, %p2609_p2 }
  0x2d   :  { %2617 = shalt.err (!%p2614_p4)
}
  0x2e   :  { %s2618_s5 = scalar_lea.vmem %s26_s22, 512  ;;  %p2623_p6 = scmp.lt.s32.totalorder %s26_s22, %s26_s22 }
  0x2f   :  { %p2619_p5 = scmp.ne.s32.totalorder %s26_s22, %s2618_s5  ;;  %p2624_p7 = scmp.lt.s32.totalorder %s2618_s5, %s2618_s5 }
  0x31   :  { %p2625_p8 = por %p2624_p7, %p2623_p6 }
  0x33   :  { %p2626_p9 = pnand %p2625_p8, %p2619_p5 }
  0x35   :  { %2629 = shalt.err (!%p2626_p9)
}
  0x36   :  { %31 = dma.hbm_to_vmem [thread:$0]  %s3146_s0, 512, %s26_s22, [#allocation5], %s2754_s25, %s2754_s25, %s2755_s26  }
  0x37   :  { %s2630_s19 = scalar_lea.hbm %s3148_s2, 5120 }
  0x38   :  { %p2631_p10 = scmp.ne.s32.totalorder %s3148_s2, %s2630_s19  ;;  %p2634_p11 = scmp.lt.u32.totalorder %s2630_s19, %s3148_s2 }
  0x3a   :  { %p2636_p12 = pnand %p2634_p11, %p2631_p10 }
  0x3c   :  { %2639 = shalt.err (!%p2636_p12)
}
  0x3d   :  { %s2640_s28 = scalar_lea.vmem %s2865_s24, 5120  ;;  %p2645_p0 = scmp.lt.s32.totalorder %s2865_s24, %s2865_s24 }
  0x3e   :  { %p2641_p13 = scmp.ne.s32.totalorder %s2865_s24, %s2640_s28  ;;  %p2646_p1 = scmp.lt.s32.totalorder %s2640_s28, %s2640_s28 }
  0x40   :  { %p2647_p2 = por %p2646_p1, %p2645_p0 }
  0x42   :  { %p2648_p3 = pnand %p2647_p2, %p2641_p13 }
  0x44   :  { %2651 = shalt.err (!%p2648_p3)
}
  0x45   :  { %s2760_s0 = smov 320   ;;  %s2761_s22 = smov 20  }
  0x46   :  { %55 = dma.hbm_to_vmem [thread:$0]  %s3148_s2, 5120, %s2865_s24, [#allocation8], %s2760_s0, %s2760_s0, %s2761_s22  }
  0x47   :  { %s2762_s11 = smov [#allocation12]   ;;  %s2763_s13 = smov [#allocation13]  }
  0x48   :  { %s77_s12 = sshll.u32 %s2762_s11, 4  ;;  %s89_s5 = sshll.u32 %s2763_s13, 4  ;;  %s78_s12 = int_to_ptr.vmem [resolvable:$true] %s77_s12  ;;  %s2899_s5 = int_to_ptr.vmem [resolvable:$true] %s89_s5 }
  0x49   :  { %s2652_s17 = scalar_lea.hbm %s3152_s6, 4096 }
  0x4a   :  { %p2653_p4 = scmp.ne.s32.totalorder %s3152_s6, %s2652_s17  ;;  %p2656_p5 = scmp.lt.u32.totalorder %s2652_s17, %s3152_s6 }
  0x4c   :  { %p2658_p6 = pnand %p2656_p5, %p2653_p4 }
  0x4e   :  { %2661 = shalt.err (!%p2658_p6)
}
  0x4f   :  { %s2662_s2 = scalar_lea.vmem %s78_s12, 4096  ;;  %p2667_p8 = scmp.lt.s32.totalorder %s78_s12, %s78_s12 }
  0x50   :  { %p2663_p7 = scmp.ne.s32.totalorder %s78_s12, %s2662_s2  ;;  %p2668_p9 = scmp.lt.s32.totalorder %s2662_s2, %s2662_s2 }
  0x52   :  { %p2669_p10 = por %p2668_p9, %p2667_p8 }
  0x54   :  { %p2670_p11 = pnand %p2669_p10, %p2663_p7 }
  0x56   :  { %2673 = shalt.err (!%p2670_p11)
}
  0x57   :  { %83 = dma.hbm_to_vmem [thread:$0]  %s3152_s6, 4096, %s78_s12, [#allocation11], %s2756_s1, %s2756_s1, %s2757_s14  }
  0x58   :  { %s2674_s0 = scalar_lea.hbm %s3153_s7, 1024 }
  0x59   :  { %p2675_p12 = scmp.ne.s32.totalorder %s3153_s7, %s2674_s0  ;;  %p2678_p13 = scmp.lt.u32.totalorder %s2674_s0, %s3153_s7 }
  0x5b   :  { %p2680_p0 = pnand %p2678_p13, %p2675_p12 }
  0x5d   :  { %2683 = shalt.err (!%p2680_p0)
}
  0x5e   :  { %s2684_s13 = scalar_lea.vmem %s2899_s5, 1024  ;;  %p2689_p2 = scmp.lt.s32.totalorder %s2899_s5, %s2899_s5 }
  0x5f   :  { %p2685_p1 = scmp.ne.s32.totalorder %s2899_s5, %s2684_s13  ;;  %p2690_p3 = scmp.lt.s32.totalorder %s2684_s13, %s2684_s13 }
  0x61   :  { %p2691_p4 = por %p2690_p3, %p2689_p2 }
  0x63   :  { %p2692_p5 = pnand %p2691_p4, %p2685_p1 }
  0x65   :  { %2695 = shalt.err (!%p2692_p5)
}
  0x66   :  { %95 = dma.hbm_to_vmem [thread:$0]  %s3153_s7, 1024, %s2899_s5, [#allocation14], %s2754_s25, %s2754_s25, %s2755_s26  }
  0x67   :  { %2730 = dma.done.wait [#allocation5], 512  }
  0x68   :  { %2731 = vsyncadd [#allocation5], 4294966784 }
  0x69   :  { %2732 = dma.done.wait [#allocation8], 6144  }
  0x6a   :  { %2733 = vsyncadd [#allocation8], 4294961152 }
  0x6b   :  { %2734 = dma.done.wait [#allocation11], 8192  }
  0x6c   :  { %2735 = vsyncadd [#allocation11], 4294959104 }
  0x6d   :  { %2736 = dma.done.wait [#allocation14], 1024  }
  0x6e   :  { %2737 = vsyncadd [#allocation14], 4294966272  ;;  %v2339_v0 = vld [vmem:[#allocation7] sm:$0xff]   ;;  %v2340_v1 = vld [vmem:[#allocation7 + $0x8] sm:$0xff]   ;;  %v2936_v20 = vmov 0.0   ;;  %v2938_v21 = vmov 0.0  }
  0x6f   :  { %2182 = vmatprep.subr.bf16.mxu0 %v2339_v0  ;;  %2254 = vmatprep.subr.bf16.mxu1 %v2339_v0  ;;  %v2341_v2 = vld [vmem:[#allocation7 + $0x10] sm:$0xff]   ;;  %v2342_v3 = vld [vmem:[#allocation7 + $0x18] sm:$0xff]   ;;  %v2347_v4 = vld [vmem:[#allocation4] sm:$0xff]   ;;  %s2940_s7 = smov 0  }
  0x70   :  { %2183 = vmatpush3.bf16.msra.mxu0 %v2339_v0  ;;  %2262 = vmatpush3.bf16.msra.mxu1 %v2339_v0  ;;  %v2348_v5 = vld [vmem:[#allocation4 + $0x10] sm:$0xff]   ;;  %v2343_v6 = vld [vmem:[#allocation7 + $0x20] sm:$0xff]   ;;  %v2344_v7 = vld [vmem:[#allocation7 + $0x28] sm:$0xff]  }
  0x71   :  { %2184 = vmatprep.subr.bf16.mxu0 %v2340_v1  ;;  %2255 = vmatprep.subr.bf16.mxu1 %v2340_v1  ;;  %v2345_v8 = vld [vmem:[#allocation7 + $0x30] sm:$0xff]   ;;  %v2346_v9 = vld [vmem:[#allocation7 + $0x38] sm:$0xff]   ;;  %v2349_v10 = vld [vmem:[#allocation4 + $0x8] sm:$0xff]  }
  0x72   :  { %2198 = vmatprep.mubr.bf16.mxu0 %v2347_v4  ;;  %2202 = vmatprep.mubr.bf16.mxu1 %v2348_v5  ;;  %v2350_v11 = vld [vmem:[#allocation4 + $0x18] sm:$0xff]  }
  0x74   :  { %2185 = vmatpush3.bf16.msra.mxu0 %v2340_v1  ;;  %2263 = vmatpush3.bf16.msra.mxu1 %v2340_v1 }
  0x75   :  { %2186 = vmatprep.subr.bf16.mxu0 %v2341_v2  ;;  %2256 = vmatprep.subr.bf16.mxu1 %v2341_v2 }
  0x78   :  { %2187 = vmatpush3.bf16.msra.mxu0 %v2341_v2  ;;  %2264 = vmatpush3.bf16.msra.mxu1 %v2341_v2 }
  0x79   :  { %2188 = vmatprep.subr.bf16.mxu0 %v2342_v3  ;;  %2257 = vmatprep.subr.bf16.mxu1 %v2342_v3 }
  0x7c   :  { %2189 = vmatpush3.bf16.msra.mxu0 %v2342_v3  ;;  %2265 = vmatpush3.bf16.msra.mxu1 %v2342_v3 }
  0x7d   :  { %2190 = vmatprep.subr.bf16.mxu0 %v2343_v6  ;;  %2258 = vmatprep.subr.bf16.mxu1 %v2343_v6 }
  0x80   :  { %2191 = vmatpush3.bf16.msra.mxu0 %v2343_v6  ;;  %2266 = vmatpush3.bf16.msra.mxu1 %v2343_v6 }
  0x81   :  { %2192 = vmatprep.subr.bf16.mxu0 %v2344_v7  ;;  %2259 = vmatprep.subr.bf16.mxu1 %v2344_v7 }
  0x84   :  { %2193 = vmatpush3.bf16.msra.mxu0 %v2344_v7  ;;  %2267 = vmatpush3.bf16.msra.mxu1 %v2344_v7 }
  0x85   :  { %2194 = vmatprep.subr.bf16.mxu0 %v2345_v8  ;;  %2260 = vmatprep.subr.bf16.mxu1 %v2345_v8 }
  0x88   :  { %2195 = vmatpush3.bf16.msra.mxu0 %v2345_v8  ;;  %2268 = vmatpush3.bf16.msra.mxu1 %v2345_v8 }
  0x89   :  { %2196 = vmatprep.subr.bf16.mxu0 %v2346_v9  ;;  %2261 = vmatprep.subr.bf16.mxu1 %v2346_v9 }
  0x8c   :  { %2197 = vmatpush3.bf16.msra.mxu0 %v2346_v9  ;;  %2269 = vmatpush3.bf16.msra.mxu1 %v2346_v9 }
  0x8f   :  { %2199 = vmatmul.mubr.bf16.vlgmr.msra.gmra.mrb[0].mxu0 %v2349_v10  ;;  %2203 = vmatmul.mubr.bf16.vlgmr.msra.gmra.mrb[0].mxu1 %v2350_v11 }
 0x162   :  { %v2200_v12 = vpop.f32.mrb[0].mxu0  ;;  %v2204_v13 = vpop.f32.mrb[0].mxu1 }
 0x163   :  { %282 = vst [vmem:[#allocation2 + $0x10] sm:$0xff] %v2200_v12  ;;  %286 = vst [vmem:[#allocation2 + $0x30] sm:$0xff] %v2204_v13  ;;  %v249_v14 = vpop.f32.mrb[1].mxu0  ;;  %v265_v15 = vpop.f32.mrb[1].mxu1 }
 0x164   :  { %280 = vst [vmem:[#allocation2] sm:$0xff] %v249_v14  ;;  %284 = vst [vmem:[#allocation2 + $0x20] sm:$0xff] %v265_v15  ;;  %v2201_v16 = vpop.f32.mrb[2].mxu0  ;;  %v2205_v17 = vpop.f32.mrb[2].mxu1 }
 0x165   :  { %283 = vst [vmem:[#allocation2 + $0x18] sm:$0xff] %v2201_v16  ;;  %287 = vst [vmem:[#allocation2 + $0x38] sm:$0xff] %v2205_v17  ;;  %v252_v18 = vpop.f32.mrb[3].mxu0  ;;  %v268_v19 = vpop.f32.mrb[3].mxu1 }
 0x166   :  { %281 = vst [vmem:[#allocation2 + $0x8] sm:$0xff] %v252_v18  ;;  %285 = vst [vmem:[#allocation2 + $0x28] sm:$0xff] %v268_v19 }
 0x167 LB: > { %v2353_v22 = vld [vmem:[#allocation9 + $0x4] ss:$20 sps:$4 sm:$0xff]   ;;  %v2355_v23 = vld [vmem:[#allocation9] ss:$20 sps:$4 sm:$0xff]   ;;  %v2764_v24 = vmov 0   ;;  %v2953_v39 = vpack.c.bf16 %v2746_v21, %v2746_v21  ;;  %v347_v40 = vlaneseq  ;;  %vm889_vm0 = vcmask 1041409   ;;  %s2750_s7 = sphi %s2940_s7, %s293_s7   ;;  %v2746_v21 = vphi %v2938_v21, %v1821_v21   ;;  %v2742_v20 = vphi %v2936_v20, %v1819_v20  }
 0x168   : > { %612 = vmatprep.mubr.bf16.mxu0 %v2764_v24  ;;  %2352 = vset.pattern.permute.xlu0 %v2764_v24  ;;  %v2356_v25 = vld [vmem:[#allocation9 + $0x2c] ss:$20 sps:$4 sm:$0xff]   ;;  %v2358_v26 = vld [vmem:[#allocation9 + $0x28] ss:$20 sps:$4 sm:$0xff]   ;;  %v2361_v28 = vld [vmem:[#allocation9 + $0x50] ss:$20 sps:$4 sm:$0xff]  }
 0x169   : > { %580 = vmatprep.subr.bf16.mxu0 %v2353_v22  ;;  %2351 = vset.pattern.permute.xlu1 %v2764_v24  ;;  %v2359_v27 = vld [vmem:[#allocation9 + $0x54] ss:$20 sps:$4 sm:$0xff]   ;;  %v2362_v29 = vld [vmem:[#allocation9 + $0x7c] ss:$20 sps:$4 sm:$0xff]   ;;  %v2364_v30 = vld [vmem:[#allocation9 + $0x78] ss:$20 sps:$4 sm:$0xff]  }
 0x16a   : > { %581 = vmatpush1.bf16.msra.mxu0 %v2355_v23  ;;  %653 = vmatprep.mubr.bf16.mxu1 %v2764_v24  ;;  %v2365_v31 = vld [vmem:[#allocation9 + $0xa4] ss:$20 sps:$4 sm:$0xff]   ;;  %v2367_v32 = vld [vmem:[#allocation9 + $0xa0] ss:$20 sps:$4 sm:$0xff]   ;;  %v2370_v34 = vld [vmem:[#allocation9 + $0xc8] ss:$20 sps:$4 sm:$0xff]  }
 0x16b   : > { %582 = vmatprep.subr.bf16.mxu0 %v2356_v25  ;;  %v2368_v33 = vld [vmem:[#allocation9 + $0xcc] ss:$20 sps:$4 sm:$0xff]   ;;  %v2371_v35 = vld [vmem:[#allocation9 + $0xf4] ss:$20 sps:$4 sm:$0xff]   ;;  %v2373_v36 = vld [vmem:[#allocation9 + $0xf0] ss:$20 sps:$4 sm:$0xff]  }
 0x16c   : > { %v2374_v37 = vld [vmem:[#allocation9 + $0x11c] ss:$20 sps:$4 sm:$0xff]   ;;  %v2376_v38 = vld [vmem:[#allocation9 + $0x118] ss:$20 sps:$4 sm:$0xff]   ;;  %v2957_v41 = vshrl.u32 %v347_v40, 7  ;;  %vm891_vm1 = vcmask 1042434  }
 0x16d   : > { %v2765_v42 = vmov 1966171168   ;;  %v345_v45 = vld [vmem:[%s3149_s3] sm:$0x1f]  ;;  %v703_v1 = vld [vmem:[#allocation2 + $0x8] sm:$0xff]  ;;  %v704_v2 = vld [vmem:[#allocation2 + $0x10] sm:$0xff] }
 0x16e   : > { %583 = vmatpush1.bf16.msra.mxu0 %v2358_v26  ;;  %v713_v43 = vunpack.c.l.s4 %v2765_v42  ;;  %v2960_v44 = vsub.s32 0, %v2957_v41  ;;  %v702_v59 = vld [vmem:[#allocation2] sm:$0xff]  ;;  %v705_v11 = vld [vmem:[#allocation2 + $0x18] sm:$0xff]  ;;  %v707_v17 = vld [vmem:[#allocation2 + $0x28] sm:$0xff]  ;;  %vm893_vm2 = vcmask 1043459   ;;  %vm895_vm3 = vcmask 1044484  }
 0x16f   : > { %584 = vmatprep.subr.bf16.mxu0 %v2359_v27  ;;  %v706_v6 = vld [vmem:[#allocation2 + $0x20] sm:$0xff]  ;;  %v708_v22 = vld [vmem:[#allocation2 + $0x30] sm:$0xff]  ;;  %v709_v27 = vld [vmem:[#allocation2 + $0x38] sm:$0xff]  ;;  %vm897_vm4 = vcmask 1045509   ;;  %vm899_vm5 = vcmask 1046534   ;;  %vm901_vm6 = vcmask 1047559  }
 0x170   : > { %v714_v46 = vunpack.c.0.s8 %v713_v43  ;;  %v350_v47 = vrot.slane %v345_v45, %v2960_v44  ;;  %vm904_vm7 = vcmask 64512   ;;  %vm2767_vm8 = vmmov 0   ;;  %s2053_s5 = sshll.u32 %s2750_s7, 2  ;;  %s2121_s20 = sshll.u32 %s2750_s7, 3 }
 0x171   : > { %s1251_s17 = scalar_lea.vmem %s3155_s9, %s2053_s5  ;;  %s1823_s21 = scalar_lea.vmem [#allocation3], %s2121_s20 }
 0x172   : > { %585 = vmatpush1.bf16.msra.mxu0 %v2361_v28  ;;  %v717_v48 = vsub.s32 %v714_v46, %v2957_v41  ;;  %v2052_v28 = vld [vmem:[%s3150_s4] ss:$0 sm:$0xff]  ;;  %s293_s7 = sadd.s32 1, %s2750_s7  }
 0x173   : > { %586 = vmatprep.subr.bf16.mxu0 %v2362_v29  ;;  %p290_p6 = scmp.ge.s32.totalorder %s293_s7, 5  }
 0x174   :  { %vm2769_vm9 = vmmov (%p290_p6), 0   ;;  %s2770_s9 = smov (%p290_p6), [#allocation15]  }
 0x175   :  { %s1970_s2 = sshll.u32 (%p290_p6), %s2770_s9, 4  ;;  %s1971_s2 = int_to_ptr.vmem [resolvable:$true] %s1970_s2 }
 0x176   : > { %587 = vmatpush1.bf16.msra.mxu0 %v2364_v30  ;;  %p2701_p8 = scmp.lt.s32.totalorder (%p290_p6), %s1971_s2, %s1971_s2 }
 0x177   : > { %588 = vmatprep.subr.bf16.mxu0 %v2365_v31 }
 0x17a   : > { %589 = vmatpush1.bf16.msra.mxu0 %v2367_v32 }
 0x17b   : > { %590 = vmatprep.subr.bf16.mxu0 %v2368_v33 }
 0x17e   : > { %591 = vmatpush1.bf16.msra.mxu0 %v2370_v34 }
 0x17f   : > { %592 = vmatprep.subr.bf16.mxu0 %v2371_v35 }
 0x182   : > { %593 = vmatpush1.bf16.msra.mxu0 %v2373_v36 }
 0x183   : > { %594 = vmatprep.subr.bf16.mxu0 %v2374_v37 }
 0x186   : > { %595 = vmatpush1.bf16.msra.mxu0 %v2376_v38 }
 0x189   : > { %613 = vmatmul.mubr.bf16.vlgmr.msra.gmra.mrb[0].mxu0 %v2953_v39 }
 0x25c   : > { %v614_v49 = vpop.f32.mrb[0].mxu0 }
 0x25d   : > { %v615_v50 = vadd.f32 %v614_v49, %v350_v47  ;;  %v2967_v51 = vpop.f32.mrb[1].mxu0 }
 0x25e   : > { %v618_v52 = vpop.f32.mrb[2].mxu0 }
 0x25f   : > { %v711_v53 = vcombine.high %v615_v50, %v615_v50  ;;  %v718_v54 = vrot.slane %v615_v50, %v717_v48  ;;  %v619_v55 = vpop.f32.mrb[3].mxu0  ;;  %v856_v50 = vand.u32 127, %v347_v40 }
 0x261   : > { %v725_v56 = vrot.slane %v711_v53, %v717_v48  ;;  %v726_v57 = vcombine.high %v718_v54, %v718_v54  ;;  %v734_v58 = vrot.slane %v718_v54, %v717_v48  ;;  %v2982_v53 = vsub.s32 %v856_v50, %v2957_v41 }
 0x263   : > { %v727_v60 = vcombine.high %v725_v56, %v725_v56  ;;  %v741_v61 = vrot.slane %v725_v56, %v717_v48  ;;  %v748_v62 = vrot.slane %v726_v57, %v717_v48  ;;  %v756_v63 = vcombine.high %v734_v58, %v734_v58 }
 0x264   : > { %v763_v0 = vrot.slane %v734_v58, %v2960_v44 }
 0x265   : > { %v755_v3 = vrot.slane %v727_v60, %v717_v48  ;;  %v758_v4 = vcombine.high %v748_v62, %v748_v62  ;;  %v767_v5 = vrot.slane %v748_v62, %v2960_v44  ;;  %v757_v7 = vcombine.high %v741_v61, %v741_v61 }
 0x266   : > { %v771_v8 = vrot.slane %v756_v63, %v2960_v44  ;;  %v779_v9 = vrot.slane %v741_v61, %v2960_v44  ;;  %v800_v10 = vadd.f32 %v763_v0, %v702_v59 }
 0x267   : > { %v775_v12 = vrot.slane %v758_v4, %v2960_v44  ;;  %v801_v13 = vadd.f32 %v767_v5, %v703_v1  ;;  %v783_v15 = vrot.slane %v755_v3, %v2960_v44  ;;  %v759_v18 = vcombine.high %v755_v3, %v755_v3 }
 0x268   : > { %v802_v14 = vadd.f32 %v771_v8, %v704_v2  ;;  %2505 = vtanh.f32 %v800_v10  ;;  %v804_v16 = vadd.f32 %v779_v9, %v706_v6  ;;  %v787_v19 = vrot.slane %v757_v7, %v2960_v44 }
 0x269   : > { %v803_v21 = vadd.f32 %v775_v12, %v705_v11  ;;  %2507 = vtanh.f32 %v801_v13  ;;  %v805_v23 = vadd.f32 %v783_v15, %v707_v17  ;;  %v791_v25 = vrot.slane %v759_v18, %v2960_v44 }
 0x26a   : > { %2509 = vtanh.f32 %v802_v14  ;;  %v806_v26 = vadd.f32 %v787_v19, %v708_v22  ;;  %v3001_v12 = vsub.s32 2, %v2957_v41  ;;  %v3004_v13 = vsub.s32 1, %v2957_v41 }
 0x26b   : > { %2511 = vtanh.f32 %v804_v16  ;;  %v807_v30 = vadd.f32 %v791_v25, %v709_v27  ;;  %v3007_v14 = vsub.s32 3, %v2957_v41  ;;  %v3013_v19 = vsub.s32 4, %v2957_v41 }
 0x26c   : > { %2513 = vtanh.f32 %v803_v21 }
 0x26d   : > { %2515 = vtanh.f32 %v805_v23 }
 0x26e   : > { %2517 = vtanh.f32 %v806_v26 }
 0x26f   : > { %2519 = vtanh.f32 %v807_v30 }
 0x272   : > { %v2506_v29 = vpop.eup %2505 }
 0x273   : > { %v823_v31 = vmul.f32 %v2506_v29, %v2052_v28  ;;  %v2508_v32 = vpop.eup %2507 }
 0x274   : > { %v2510_v33 = vpop.eup %2509  ;;  %v824_v36 = vmul.f32 %v2508_v32, %v2052_v28  ;;  %v935_v32 = vsub.s32 6, %v2957_v41 }
 0x275   : > { %831 = vadd.xlane.f32.xlu0 %v823_v31  ;;  %v2512_v34 = vpop.eup %2511  ;;  %v825_v35 = vmul.f32 %v2510_v33, %v2052_v28 }
 0x276   : > { %v2514_v37 = vpop.eup %2513  ;;  %v827_v43 = vmul.f32 %v2512_v34, %v2052_v28 }
 0x277   : > { %835 = vadd.xlane.f32.xlu1 %v825_v35  ;;  %v2516_v38 = vpop.eup %2515  ;;  %v826_v42 = vmul.f32 %v2514_v37, %v2052_v28 }
 0x278   : > { %v2518_v45 = vpop.eup %2517  ;;  %v828_v46 = vmul.f32 %v2516_v38, %v2052_v28 }
 0x279   : > { %833 = vadd.xlane.f32.xlu0 %v824_v36  ;;  %v829_v47 = vmul.f32 %v2518_v45, %v2052_v28  ;;  %v2520_v48 = vpop.eup %2519  ;;  %v939_v36 = vsub.s32 7, %v2957_v41 }
 0x27a   : > { %v830_v49 = vmul.f32 %v2520_v48, %v2052_v28  ;;  %v931_v28 = vsub.s32 5, %v2957_v41  ;;  %v2465_v41 = vld [vmem:[#allocation10 + $0x24] ss:$16 sps:$4 sm:$0xff]  }
 0x27b   : > { %837 = vadd.xlane.f32.xlu1 %v826_v42 }
 0x27d   : > { %839 = vadd.xlane.f32.xlu0 %v827_v43 }
 0x27f   : > { %841 = vadd.xlane.f32.xlu1 %v828_v46 }
 0x281   : > { %843 = vadd.xlane.f32.xlu0 %v829_v47 }
 0x283   : > { %845 = vadd.xlane.f32.xlu1 %v830_v49 }
 0x302   : > { %v832_v52 = vpop.xlane.xlu0 %831 }
 0x303   : > { %v860_v56 = vrot.slane %v832_v52, %v2982_v53 }
 0x304   : > { %v836_v54 = vpop.xlane.xlu1 %835 }
 0x305   : > { %v868_v58 = vrot.slane %v836_v54, %v2982_v53 }
 0x306   : > { %v834_v55 = vpop.xlane.xlu0 %833 }
 0x307   : > { %v864_v57 = vrot.slane %v834_v55, %v2982_v53 }
 0x308   : > { %v838_v40 = vpop.xlane.xlu1 %837 }
 0x309   : > { %v890_v59 = vsel %vm889_vm0, %v864_v57, %v860_v56  ;;  %v872_v62 = vrot.slane %v838_v40, %v2982_v53 }
 0x30a   : > { %v892_v60 = vsel %vm891_vm1, %v868_v58, %v890_v59  ;;  %v840_v61 = vpop.xlane.xlu0 %839 }
 0x30b   : > { %v876_v63 = vrot.slane %v840_v61, %v2982_v53  ;;  %v894_v0 = vsel %vm893_vm2, %v872_v62, %v892_v60 }
 0x30c   : > { %v842_v2 = vpop.xlane.xlu1 %841 }
 0x30d   : > { %v896_v1 = vsel %vm895_vm3, %v876_v63, %v894_v0  ;;  %v880_v4 = vrot.slane %v842_v2, %v2982_v53 }
 0x30e   : > { %v844_v3 = vpop.xlane.xlu0 %843 }
 0x30f   : > { %v884_v5 = vrot.slane %v844_v3, %v2982_v53  ;;  %v898_v6 = vsel %vm897_vm4, %v880_v4, %v896_v1 }
 0x310   : > { %v846_v7 = vpop.xlane.xlu1 %845 }
 0x311   : > { %v900_v8 = vsel %vm899_vm5, %v884_v5, %v898_v6  ;;  %v888_v9 = vrot.slane %v846_v7, %v2982_v53 }
 0x313   : > { %v902_v10 = vsel %vm901_vm6, %v888_v9, %v900_v8 }
 0x314   : > { %v905_v11 = vsel %vm904_vm7, %v902_v10, -inf }
 0x315   : > { %906 = vmax.xlane.f32.xlu0 %v905_v11 }
 0x3a2   : > { %v907_v15 = vpop.xlane.xlu0 %906 }
 0x3a3   : > { %v912_v16 = vrot.slane %v907_v15, %v2960_v44  ;;  %v916_v17 = vrot.slane %v907_v15, %v3004_v13  ;;  %v920_v18 = vrot.slane %v907_v15, %v3001_v12  ;;  %v924_v21 = vrot.slane %v907_v15, %v3007_v14 }
 0x3a4   : > { %v928_v29 = vrot.slane %v907_v15, %v3013_v19  ;;  %v932_v33 = vrot.slane %v907_v15, %v931_v28  ;;  %v936_v37 = vrot.slane %v907_v15, %v935_v32  ;;  %v940_v46 = vrot.slane %v907_v15, %v939_v36 }
 0x3a5   : > { %v949_v22 = vsub.f32 %v832_v52, %v912_v16  ;;  %v950_v23 = vsub.f32 %v834_v55, %v916_v17  ;;  %v951_v25 = vsub.f32 %v836_v54, %v920_v18  ;;  %v952_v30 = vsub.f32 %v838_v40, %v924_v21 }
 0x3a6   : > { %v953_v34 = vsub.f32 %v840_v61, %v928_v29  ;;  %v954_v38 = vsub.f32 %v842_v2, %v932_v33  ;;  %v955_v47 = vsub.f32 %v844_v3, %v936_v37  ;;  %v956_v50 = vsub.f32 %v846_v7, %v940_v46  ;;  %v2380_v29 = vld [vmem:[#allocation9 + $0x10] ss:$20 sps:$4 sm:$0xff]   ;;  %v2393_v46 = vld [vmem:[#allocation9 + $0xac] ss:$20 sps:$4 sm:$0xff]  }
 0x3a7   : > { %v957_v26 = vmul.f32 1.442695, %v949_v22  ;;  %v959_v27 = vmul.f32 1.442695, %v950_v23  ;;  %v961_v31 = vmul.f32 1.442695, %v951_v25 }
 0x3a8   : > { %v963_v35 = vmul.f32 1.442695, %v952_v30  ;;  %v965_v42 = vmul.f32 1.442695, %v953_v34  ;;  %v967_v48 = vmul.f32 1.442695, %v954_v38 }
 0x3a9   : > { %2521 = vpow2.f32 %v957_v26  ;;  %v969_v52 = vmul.f32 1.442695, %v955_v47  ;;  %v971_v55 = vmul.f32 1.442695, %v956_v50  ;;  %v2377_v25 = vld [vmem:[#allocation9 + $0xc] ss:$20 sps:$4 sm:$0xff]  }
 0x3aa   : > { %2523 = vpow2.f32 %v959_v27  ;;  %v2379_v26 = vld [vmem:[#allocation9 + $0x8] ss:$20 sps:$4 sm:$0xff]   ;;  %v2766_v27 = vmov 0.0   ;;  %621 = vmatprep.subr.bf16.mxu1 %v2377_v25  ;;  %v2387_v34 = vld [vmem:[#allocation9 + $0x58] ss:$20 sps:$4 sm:$0xff]  }
 0x3ab   : > { %2525 = vpow2.f32 %v961_v31  ;;  %2206 = vmatprep.subr.bf16.mxu0 %v2766_v27  ;;  %v2381_v30 = vld [vmem:[#allocation9 + $0x34] ss:$20 sps:$4 sm:$0xff]   ;;  %2222 = vmatprep.mubr.msk.bf16.mxu0 %vm2767_vm8, %v2766_v27  ;;  %v2383_v31 = vld [vmem:[#allocation9 + $0x30] ss:$20 sps:$4 sm:$0xff]  }
 0x3ac   : > { %2527 = vpow2.f32 %v963_v35  ;;  %622 = vmatpush1.bf16.msra.mxu1 %v2379_v26  ;;  %2207 = vmatpush3.bf16.msra.mxu0 %v2380_v29  ;;  %v2385_v33 = vld [vmem:[#allocation9 + $0x5c] ss:$20 sps:$4 sm:$0xff]   ;;  %v2388_v35 = vld [vmem:[#allocation9 + $0x60] ss:$20 sps:$4 sm:$0xff]   ;;  %v2389_v37 = vld [vmem:[#allocation9 + $0x84] ss:$20 sps:$4 sm:$0xff]  }
 0x3ad   : > { %2529 = vpow2.f32 %v965_v42  ;;  %623 = vmatprep.subr.bf16.mxu1 %v2381_v30  ;;  %2208 = vmatprep.subr.bf16.mxu0 %v2766_v27  ;;  %v2391_v38 = vld [vmem:[#allocation9 + $0x80] ss:$20 sps:$4 sm:$0xff]   ;;  %v2392_v42 = vld [vmem:[#allocation9 + $0x88] ss:$20 sps:$4 sm:$0xff]  }
 0x3ae   : > { %2531 = vpow2.f32 %v967_v48  ;;  %v2395_v47 = vld [vmem:[#allocation9 + $0xa8] ss:$20 sps:$4 sm:$0xff]   ;;  %v2396_v48 = vld [vmem:[#allocation9 + $0xb0] ss:$20 sps:$4 sm:$0xff]  }
 0x3af   : > { %2533 = vpow2.f32 %v969_v52  ;;  %v2397_v50 = vld [vmem:[#allocation9 + $0xd4] ss:$20 sps:$4 sm:$0xff]   ;;  %v2399_v52 = vld [vmem:[#allocation9 + $0xd0] ss:$20 sps:$4 sm:$0xff]  }
 0x3b0   : > { %2535 = vpow2.f32 %v971_v55  ;;  %624 = vmatpush1.bf16.msra.mxu1 %v2383_v31  ;;  %v2400_v55 = vld [vmem:[#allocation9 + $0xd8] ss:$20 sps:$4 sm:$0xff]  }
 0x3b1   : > { %625 = vmatprep.subr.bf16.mxu1 %v2385_v33  ;;  %v2438_v33 = vld [vmem:[#allocation12 + $0x8c] ss:$16 sps:$4 sm:$0xff]  }
 0x3b3   : > { %v3024_v43 = vpop.eup %2521 }
 0x3b4   : > { %v3026_v45 = vpop.eup %2523  ;;  %982 = vperm.xlu1 %2351, %v3024_v43   ;;  %626 = vmatpush1.bf16.msra.mxu1 %v2387_v34  ;;  %v2433_v34 = vld [vmem:[#allocation12 + $0x80] ss:$16 sps:$4 sm:$0xff]  }
 0x3b5   : > { %985 = vperm.xlu0 %2352, %v3026_v45   ;;  %v3032_v49 = vpop.eup %2525  ;;  %627 = vmatprep.subr.bf16.mxu1 %v2389_v37  ;;  %v2444_v37 = vld [vmem:[#allocation12 + $0xac] ss:$16 sps:$4 sm:$0xff]  }
 0x3b6   : > { %v3035_v54 = vpop.eup %2527 }
 0x3b7   : > { %v3038_v56 = vpop.eup %2529 }
 0x3b8   : > { %988 = vperm.xlu1 %2351, %v3032_v49   ;;  %v3041_v57 = vpop.eup %2531  ;;  %628 = vmatpush1.bf16.msra.mxu1 %v2391_v38  ;;  %v2439_v38 = vld [vmem:[#allocation12 + $0xa0] ss:$16 sps:$4 sm:$0xff]  }
 0x3b9   : > { %v3044_v58 = vpop.eup %2533  ;;  %629 = vmatprep.subr.bf16.mxu1 %v2393_v46 }
 0x3ba   : > { %v3047_v59 = vpop.eup %2535 }
 0x3bc   : > { %991 = vperm.xlu1 %2351, %v3035_v54   ;;  %630 = vmatpush1.bf16.msra.mxu1 %v2395_v47  ;;  %v2447_v47 = vld [vmem:[#allocation12 + $0xc4] ss:$16 sps:$4 sm:$0xff]  }
 0x3bd   : > { %631 = vmatprep.subr.bf16.mxu1 %v2397_v50  ;;  %v2448_v50 = vld [vmem:[#allocation12 + $0xc8] ss:$16 sps:$4 sm:$0xff]  }
 0x3c0   : > { %994 = vperm.xlu1 %2351, %v3038_v56   ;;  %632 = vmatpush1.bf16.msra.mxu1 %v2399_v52 }
 0x3c4   : > { %997 = vperm.xlu1 %2351, %v3041_v57  }
 0x3c8   : > { %1000 = vperm.xlu1 %2351, %v3044_v58  }
 0x3cc   : > { %1003 = vperm.xlu1 %2351, %v3047_v59  }
 0x433   : > { %v983_v60 = vpop.permute.xlu1 %982 }
 0x434   : > { %v986_v63 = vpop.permute.xlu0 %985  ;;  %v1008_v2 = vrot.slane %v983_v60, %v2982_v53  ;;  %v2401_v60 = vld [vmem:[#allocation9 + $0xfc] ss:$20 sps:$4 sm:$0xff]  }
 0x435   : > { %v1012_v1 = vrot.slane %v986_v63, %v2982_v53  ;;  %633 = vmatprep.subr.bf16.mxu1 %v2401_v60  ;;  %v2407_v63 = vld [vmem:[#allocation9 + $0x120] ss:$20 sps:$4 sm:$0xff]   ;;  %v2456_v60 = vld [vmem:[#allocation12 + $0xec] ss:$16 sps:$4 sm:$0xff]  }
 0x437   : > { %v989_v40 = vpop.permute.xlu1 %988  ;;  %v1037_v7 = vsel %vm889_vm0, %v1012_v1, %v1008_v2  ;;  %v2411_v1 = vld [vmem:[#allocation12 + $0x4] ss:$16 sps:$4 sm:$0xff]   ;;  %v2414_v2 = vld [vmem:[#allocation12 + $0xc] ss:$16 sps:$4 sm:$0xff]  }
 0x438   : > { %v1016_v3 = vrot.slane %v989_v40, %v2982_v53  ;;  %v2403_v40 = vld [vmem:[#allocation9 + $0xf8] ss:$20 sps:$4 sm:$0xff]  }
 0x439   : > { %634 = vmatpush1.bf16.msra.mxu1 %v2403_v40  ;;  %v2451_v40 = vld [vmem:[#allocation12 + $0xe0] ss:$16 sps:$4 sm:$0xff]  }
 0x43a   : > { %v1038_v9 = vsel %vm891_vm1, %v1016_v3, %v1037_v7  ;;  %v2409_v3 = vld [vmem:[#allocation12] ss:$16 sps:$4 sm:$0xff]  }
 0x43b   : > { %v992_v61 = vpop.permute.xlu1 %991  ;;  %v2415_v7 = vld [vmem:[#allocation12 + $0x20] ss:$16 sps:$4 sm:$0xff]  }
 0x43c   : > { %v1020_v4 = vrot.slane %v992_v61, %v2982_v53  ;;  %v2404_v61 = vld [vmem:[#allocation9 + $0x100] ss:$20 sps:$4 sm:$0xff]  }
 0x43e   : > { %v1039_v11 = vsel %vm893_vm2, %v1020_v4, %v1038_v9  ;;  %v2412_v4 = vld [vmem:[#allocation12 + $0x8] ss:$16 sps:$4 sm:$0xff]   ;;  %v2423_v9 = vld [vmem:[#allocation12 + $0x44] ss:$16 sps:$4 sm:$0xff]  }
 0x43f   : > { %v995_v62 = vpop.permute.xlu1 %994 }
 0x440   : > { %v1024_v5 = vrot.slane %v995_v62, %v2982_v53  ;;  %v2405_v62 = vld [vmem:[#allocation9 + $0x124] ss:$20 sps:$4 sm:$0xff]  }
 0x441   : > { %635 = vmatprep.subr.bf16.mxu1 %v2405_v62 }
 0x442   : > { %v1040_v15 = vsel %vm895_vm3, %v1024_v5, %v1039_v11  ;;  %636 = vmatpush1.bf16.msra.mxu1 %v2407_v63  ;;  %v2417_v5 = vld [vmem:[#allocation12 + $0x24] ss:$16 sps:$4 sm:$0xff]   ;;  %v2421_v11 = vld [vmem:[#allocation12 + $0x40] ss:$16 sps:$4 sm:$0xff]   ;;  %v2462_v63 = vld [vmem:[#allocation10 + $0xc] ss:$16 sps:$4 sm:$0xff]  }
 0x443   : > { %v998_v0 = vpop.permute.xlu1 %997  ;;  %1445 = vmatprep.subr.bf16.mxu1 %v2411_v1  ;;  %v1252_v1 = vld [vmem:[%s1251_s17] sm:$0xf] }
 0x444   : > { %v1028_v8 = vrot.slane %v998_v0, %v2982_v53  ;;  %v2408_v0 = vld [vmem:[#allocation9 + $0x128] ss:$20 sps:$4 sm:$0xff]  }
 0x445   : > { %654 = vmatmul.mubr.bf16.vlgmr.msra.gmra.mrb[0].mxu1 %v2953_v39 }
 0x446   : > { %v1041_v17 = vsel %vm897_vm4, %v1028_v8, %v1040_v15  ;;  %1446 = vmatpush1.bf16.msra.mxu1 %v2409_v3  ;;  %v2418_v8 = vld [vmem:[#allocation12 + $0x28] ss:$16 sps:$4 sm:$0xff]   ;;  %1477 = vmatprep.mubr.bf16.mxu1 %v2764_v24 }
 0x447   : > { %v1001_v6 = vpop.permute.xlu1 %1000  ;;  %1447 = vmatprep.subr.bf16.mxu1 %v2417_v5  ;;  %v2424_v15 = vld [vmem:[#allocation12 + $0x48] ss:$16 sps:$4 sm:$0xff]   ;;  %v2474_v5 = vld [vmem:[#allocation10 + $0x4c] ss:$16 sps:$4 sm:$0xff]  }
 0x448   : > { %v1032_v10 = vrot.slane %v1001_v6, %v2982_v53  ;;  %v2420_v6 = vld [vmem:[#allocation12 + $0x2c] ss:$16 sps:$4 sm:$0xff]   ;;  %v2466_v3 = vld [vmem:[#allocation10 + $0x28] ss:$16 sps:$4 sm:$0xff]  }
 0x44a   : > { %v1042_v21 = vsel %vm899_vm5, %v1032_v10, %v1041_v17  ;;  %v2426_v10 = vld [vmem:[#allocation12 + $0x4c] ss:$16 sps:$4 sm:$0xff]   ;;  %1448 = vmatpush1.bf16.msra.mxu1 %v2415_v7  ;;  %v2427_v17 = vld [vmem:[#allocation12 + $0x60] ss:$16 sps:$4 sm:$0xff]   ;;  %v2477_v7 = vld [vmem:[#allocation10 + $0x64] ss:$16 sps:$4 sm:$0xff]  }
 0x44b   : > { %v1004_v16 = vpop.permute.xlu1 %1003  ;;  %1449 = vmatprep.subr.bf16.mxu1 %v2423_v9  ;;  %v2475_v9 = vld [vmem:[#allocation10 + $0x60] ss:$16 sps:$4 sm:$0xff]  }
 0x44c   : > { %v1036_v18 = vrot.slane %v1004_v16, %v2982_v53  ;;  %v2384_v53 = vld [vmem:[#allocation9 + $0x38] ss:$20 sps:$4 sm:$0xff]   ;;  %v2429_v16 = vld [vmem:[#allocation12 + $0x64] ss:$16 sps:$4 sm:$0xff]  }
 0x44d   : > { %2209 = vmatpush3.bf16.msra.mxu0 %v2384_v53  ;;  %v2435_v53 = vld [vmem:[#allocation12 + $0x84] ss:$16 sps:$4 sm:$0xff]  }
 0x44e   : > { %v1043_v22 = vsel %vm901_vm6, %v1036_v18, %v1042_v21  ;;  %2210 = vmatprep.subr.bf16.mxu0 %v2766_v27  ;;  %1450 = vmatpush1.bf16.msra.mxu1 %v2421_v11  ;;  %v2430_v18 = vld [vmem:[#allocation12 + $0x68] ss:$16 sps:$4 sm:$0xff]   ;;  %v2483_v11 = vld [vmem:[#allocation10 + $0x84] ss:$16 sps:$4 sm:$0xff]  }
 0x44f   : > { %v1045_v23 = vsel %vm904_vm7, %v1043_v22, 0.0  ;;  %1451 = vmatprep.subr.bf16.mxu1 %v2429_v16  ;;  %v2484_v16 = vld [vmem:[#allocation10 + $0x88] ss:$16 sps:$4 sm:$0xff]  }
 0x450   : > { %1046 = vadd.xlane.f32.xlu1 %v1045_v23 }
 0x451   : > { %2211 = vmatpush3.bf16.msra.mxu0 %v2388_v35  ;;  %v2436_v35 = vld [vmem:[#allocation12 + $0x88] ss:$16 sps:$4 sm:$0xff]  }
 0x452   : > { %2212 = vmatprep.subr.bf16.mxu0 %v2766_v27  ;;  %1452 = vmatpush1.bf16.msra.mxu1 %v2427_v17  ;;  %v2492_v17 = vld [vmem:[#allocation10 + $0xac] ss:$16 sps:$4 sm:$0xff]  }
 0x453   : > { %1453 = vmatprep.subr.bf16.mxu1 %v2435_v53  ;;  %v2132_v53 = vld [vmem:[#allocation4] sm:$0xff]  }
 0x455   : > { %2213 = vmatpush3.bf16.msra.mxu0 %v2392_v42  ;;  %v2442_v42 = vld [vmem:[#allocation12 + $0xa8] ss:$16 sps:$4 sm:$0xff]  }
 0x456   : > { %2214 = vmatprep.subr.bf16.mxu0 %v2766_v27  ;;  %1454 = vmatpush1.bf16.msra.mxu1 %v2433_v34  ;;  %v2134_v34 = vunpack.c.h.bf16 %v2132_v53 }
 0x459   : > { %2215 = vmatpush3.bf16.msra.mxu0 %v2396_v48  ;;  %v2450_v48 = vld [vmem:[#allocation12 + $0xcc] ss:$16 sps:$4 sm:$0xff]  }
 0x45a   : > { %2216 = vmatprep.subr.bf16.mxu0 %v2766_v27 }
 0x45d   : > { %2217 = vmatpush3.bf16.msra.mxu0 %v2400_v55 }
 0x45e   : > { %2218 = vmatprep.subr.bf16.mxu0 %v2766_v27 }
 0x461   : > { %2219 = vmatpush3.bf16.msra.mxu0 %v2404_v61 }
 0x462   : > { %2220 = vmatprep.subr.bf16.mxu0 %v2766_v27 }
 0x465   : > { %2221 = vmatpush3.bf16.msra.mxu0 %v2408_v0  ;;  %v2457_v0 = vld [vmem:[#allocation10] ss:$16 sps:$4 sm:$0xff]  }
 0x466   : > { %1486 = vmatprep.subr.bf16.mxu0 %v2414_v2  ;;  %v2463_v2 = vld [vmem:[#allocation10 + $0x20] ss:$16 sps:$4 sm:$0xff]  }
 0x468   : > { %2223 = vmatmul.mubr.bf16.vlgmr.msra.gmra.mrb[4].mxu0 %v2953_v39  ;;  %v2432_v39 = vld [vmem:[#allocation12 + $0x6c] ss:$16 sps:$4 sm:$0xff]  }
 0x469   : > { %1487 = vmatpush1.bf16.msra.mxu0 %v2412_v4  ;;  %1518 = vmatprep.mubr.bf16.mxu0 %v2764_v24  ;;  %v2471_v4 = vld [vmem:[#allocation10 + $0x44] ss:$16 sps:$4 sm:$0xff]  }
 0x46a   : > { %1488 = vmatprep.subr.bf16.mxu0 %v2420_v6  ;;  %v2469_v6 = vld [vmem:[#allocation10 + $0x40] ss:$16 sps:$4 sm:$0xff]  }
 0x46d   : > { %1489 = vmatpush1.bf16.msra.mxu0 %v2418_v8  ;;  %v2480_v8 = vld [vmem:[#allocation10 + $0x6c] ss:$16 sps:$4 sm:$0xff]  }
 0x46e   : > { %1490 = vmatprep.subr.bf16.mxu0 %v2426_v10  ;;  %v2478_v10 = vld [vmem:[#allocation10 + $0x68] ss:$16 sps:$4 sm:$0xff]  }
 0x471   : > { %1491 = vmatpush1.bf16.msra.mxu0 %v2424_v15  ;;  %v2486_v15 = vld [vmem:[#allocation10 + $0x8c] ss:$16 sps:$4 sm:$0xff]  }
 0x472   : > { %1492 = vmatprep.subr.bf16.mxu0 %v2432_v39  ;;  %v2489_v39 = vld [vmem:[#allocation10 + $0xa4] ss:$16 sps:$4 sm:$0xff]  }
 0x475   : > { %1493 = vmatpush1.bf16.msra.mxu0 %v2430_v18  ;;  %v2487_v18 = vld [vmem:[#allocation10 + $0xa0] ss:$16 sps:$4 sm:$0xff]  }
 0x476   : > { %1494 = vmatprep.subr.bf16.mxu0 %v2438_v33 }
 0x479   : > { %1495 = vmatpush1.bf16.msra.mxu0 %v2436_v35  ;;  %v2133_v35 = vunpack.c.l.bf16 %v2132_v53 }
 0x47a   : > { %1496 = vmatprep.subr.bf16.mxu0 %v2444_v37 }
 0x47d   : > { %1497 = vmatpush1.bf16.msra.mxu0 %v2442_v42 }
 0x47e   : > { %1498 = vmatprep.subr.bf16.mxu0 %v2450_v48 }
 0x481   : > { %1499 = vmatpush1.bf16.msra.mxu0 %v2448_v50  ;;  %v2148_v50 = vld [vmem:[#allocation4 + $0x10] sm:$0xff]  }
 0x482   : > { %1500 = vmatprep.subr.bf16.mxu0 %v2456_v60 }
 0x4dd   : > { %v1047_v21 = vpop.xlane.xlu1 %1046 }
 0x4de   : > { %2537 = vrcp.f32 %v1047_v21  ;;  %v2490_v21 = vld [vmem:[#allocation10 + $0xa8] ss:$16 sps:$4 sm:$0xff]  }
 0x4e8   : > { %v2538_v22 = vpop.eup %2537 }
 0x4e9   : > { %v1053_v23 = vrot.slane %v2538_v22, %v2960_v44  ;;  %v1057_v26 = vrot.slane %v2538_v22, %v3004_v13  ;;  %v1061_v29 = vrot.slane %v2538_v22, %v3001_v12  ;;  %v1065_v31 = vrot.slane %v2538_v22, %v3007_v14 }
 0x4ea   : > { %v1073_v46 = vrot.slane %v2538_v22, %v931_v28  ;;  %v1077_v55 = vrot.slane %v2538_v22, %v935_v32  ;;  %v2454_v28 = vld [vmem:[#allocation12 + $0xe8] ss:$16 sps:$4 sm:$0xff]   ;;  %v1081_v62 = vrot.slane %v2538_v22, %v939_v36  ;;  %v2468_v36 = vld [vmem:[#allocation10 + $0x2c] ss:$16 sps:$4 sm:$0xff]  }
 0x4eb   : > { %v1090_v25 = vmul.f32 %v3024_v43, %v1053_v23  ;;  %v1091_v27 = vmul.f32 %v3026_v45, %v1057_v26  ;;  %v1092_v30 = vmul.f32 %v3032_v49, %v1061_v29  ;;  %v1093_v44 = vmul.f32 %v3035_v54, %v1065_v31  ;;  %v2441_v45 = vld [vmem:[#allocation12 + $0xa4] ss:$16 sps:$4 sm:$0xff]   ;;  %v2445_v54 = vld [vmem:[#allocation12 + $0xc0] ss:$16 sps:$4 sm:$0xff]   ;;  %1501 = vmatpush1.bf16.msra.mxu0 %v2454_v28  ;;  %v2460_v32 = vld [vmem:[#allocation10 + $0x8] ss:$16 sps:$4 sm:$0xff]  }
 0x4ec   : > { %v1069_v43 = vrot.slane %v2538_v22, %v3013_v19  ;;  %1455 = vmatprep.subr.bf16.mxu1 %v2441_v45  ;;  %v1095_v52 = vmul.f32 %v3041_v57, %v1073_v46  ;;  %v1096_v61 = vmul.f32 %v3044_v58, %v1077_v55  ;;  %v2459_v57 = vld [vmem:[#allocation10 + $0x4] ss:$16 sps:$4 sm:$0xff]   ;;  %1753 = vmatprep.subr.bf16.mxu0 %v2462_v63  ;;  %v2498_v23 = vld [vmem:[#allocation10 + $0xcc] ss:$16 sps:$4 sm:$0xff]   ;;  %v2496_v26 = vld [vmem:[#allocation10 + $0xc8] ss:$16 sps:$4 sm:$0xff]   ;;  %v2141_v28 = vunpack.c.l.bf16 %v2148_v50 }
 0x4ed   : > { %1116 = vperm.xlu0 %2352, %v1090_v25   ;;  %1456 = vmatpush1.bf16.msra.mxu1 %v2439_v38  ;;  %v1097_v58 = vmul.f32 %v3047_v59, %v1081_v62  ;;  %v2472_v59 = vld [vmem:[#allocation10 + $0x48] ss:$16 sps:$4 sm:$0xff]   ;;  %v2495_v22 = vld [vmem:[#allocation10 + $0xc4] ss:$16 sps:$4 sm:$0xff]   ;;  %v2493_v25 = vld [vmem:[#allocation10 + $0xc0] ss:$16 sps:$4 sm:$0xff]  }
 0x4ee   : > { %v1094_v49 = vmul.f32 %v3038_v56, %v1069_v43  ;;  %1457 = vmatprep.subr.bf16.mxu1 %v2447_v47  ;;  %v2453_v56 = vld [vmem:[#allocation12 + $0xe4] ss:$16 sps:$4 sm:$0xff]   ;;  %1519 = vmatmul.mubr.bf16.vlgmr.msra.gmra.mrb[8].mxu0 %v1252_v1  ;;  %v2504_v29 = vld [vmem:[#allocation10 + $0xec] ss:$16 sps:$4 sm:$0xff]   ;;  %v2502_v31 = vld [vmem:[#allocation10 + $0xe8] ss:$16 sps:$4 sm:$0xff]  }
 0x4ef   : > { %1754 = vmatpush1.bf16.msra.mxu0 %v2460_v32  ;;  %1785 = vmatprep.mubr.bf16.mxu0 %v2764_v24 }
 0x4f0   : > { %1755 = vmatprep.subr.bf16.mxu0 %v2468_v36 }
 0x4f1   : > { %1121 = vperm.xlu0 %2352, %v1091_v27   ;;  %1458 = vmatpush1.bf16.msra.mxu1 %v2445_v54  ;;  %v2501_v27 = vld [vmem:[#allocation10 + $0xe4] ss:$16 sps:$4 sm:$0xff]  }
 0x4f2   : > { %1459 = vmatprep.subr.bf16.mxu1 %v2453_v56 }
 0x4f3   : > { %1756 = vmatpush1.bf16.msra.mxu0 %v2466_v3 }
 0x4f4   : > { %1757 = vmatprep.subr.bf16.mxu0 %v2474_v5 }
 0x4f5   : > { %1126 = vperm.xlu0 %2352, %v1092_v30   ;;  %1460 = vmatpush1.bf16.msra.mxu1 %v2451_v40  ;;  %v2499_v30 = vld [vmem:[#allocation10 + $0xe0] ss:$16 sps:$4 sm:$0xff]  }
 0x4f6   : > { %1712 = vmatprep.subr.bf16.mxu1 %v2459_v57 }
 0x4f7   : > { %1758 = vmatpush1.bf16.msra.mxu0 %v2472_v59 }
 0x4f8   : > { %1478 = vmatmul.mubr.bf16.vlgmr.msra.gmra.mrb[4].mxu1 %v1252_v1  ;;  %1759 = vmatprep.subr.bf16.mxu0 %v2480_v8 }
 0x4f9   : > { %1131 = vperm.xlu0 %2352, %v1093_v44   ;;  %1713 = vmatpush1.bf16.msra.mxu1 %v2457_v0  ;;  %v2147_v44 = vld [vmem:[#allocation4 + $0x8] sm:$0xff]   ;;  %v2142_v0 = vunpack.c.h.bf16 %v2148_v50 }
 0x4fa   : > { %1744 = vmatprep.mubr.bf16.mxu1 %v2764_v24  ;;  %1714 = vmatprep.subr.bf16.mxu1 %v2465_v41  ;;  %v2481_v24 = vld [vmem:[#allocation10 + $0x80] ss:$16 sps:$4 sm:$0xff]   ;;  %v2137_v37 = vunpack.c.l.bf16 %v2147_v44  ;;  %v2138_v47 = vunpack.c.h.bf16 %v2147_v44  ;;  %v2149_v41 = vld [vmem:[#allocation4 + $0x18] sm:$0xff]  }
 0x4fb   : > { %1760 = vmatpush1.bf16.msra.mxu0 %v2478_v10  ;;  %v2145_v10 = vunpack.c.l.bf16 %v2149_v41 }
 0x4fc   : > { %1761 = vmatprep.subr.bf16.mxu0 %v2486_v15 }
 0x4fd   : > { %1136 = vperm.xlu0 %2352, %v1094_v49   ;;  %1715 = vmatpush1.bf16.msra.mxu1 %v2463_v2 }
 0x4fe   : > { %1716 = vmatprep.subr.bf16.mxu1 %v2471_v4 }
 0x4ff   : > { %1762 = vmatpush1.bf16.msra.mxu0 %v2484_v16 }
 0x500   : > { %1763 = vmatprep.subr.bf16.mxu0 %v2492_v17 }
 0x501   : > { %1141 = vperm.xlu0 %2352, %v1095_v52   ;;  %1717 = vmatpush1.bf16.msra.mxu1 %v2469_v6 }
 0x502   : > { %1718 = vmatprep.subr.bf16.mxu1 %v2477_v7 }
 0x503   : > { %1764 = vmatpush1.bf16.msra.mxu0 %v2490_v21 }
 0x504   : > { %1765 = vmatprep.subr.bf16.mxu0 %v2498_v23 }
 0x505   : > { %1146 = vperm.xlu0 %2352, %v1096_v61   ;;  %1719 = vmatpush1.bf16.msra.mxu1 %v2475_v9 }
 0x506   : > { %1720 = vmatprep.subr.bf16.mxu1 %v2483_v11 }
 0x507   : > { %1766 = vmatpush1.bf16.msra.mxu0 %v2496_v26 }
 0x508   : > { %1767 = vmatprep.subr.bf16.mxu0 %v2504_v29  ;;  %v2146_v29 = vunpack.c.h.bf16 %v2149_v41 }
 0x509   : > { %1151 = vperm.xlu0 %2352, %v1097_v58   ;;  %1721 = vmatpush1.bf16.msra.mxu1 %v2481_v24 }
 0x50a   : > { %1722 = vmatprep.subr.bf16.mxu1 %v2489_v39 }
 0x50b   : > { %1768 = vmatpush1.bf16.msra.mxu0 %v2502_v31 }
 0x50d   : > { %1723 = vmatpush1.bf16.msra.mxu1 %v2487_v18 }
 0x50e   : > { %1724 = vmatprep.subr.bf16.mxu1 %v2495_v22 }
 0x511   : > { %1725 = vmatpush1.bf16.msra.mxu1 %v2493_v25 }
 0x512   : > { %1726 = vmatprep.subr.bf16.mxu1 %v2501_v27 }
 0x515   : > { %1727 = vmatpush1.bf16.msra.mxu1 %v2499_v30 }
 0x518   : > { %v3095_v36 = vpop.f32.mrb[0].mxu1 }
 0x519   : > { %v3099_v4 = vpop.f32.mrb[1].mxu1 }
 0x51a   : > { %v659_v7 = vpop.f32.mrb[2].mxu1 }
 0x51b   : > { %v660_v11 = vpop.f32.mrb[3].mxu1 }
 0x53b   : > { %v3097_v2 = vpop.f32.mrb[4].mxu0 }
 0x53c   : > { %v2224_v5 = vpop.f32.mrb[5].mxu0 }
 0x53d   : > { %v699_v15 = vpop.f32.mrb[6].mxu0 }
 0x53e   : > { %v2225_v17 = vpop.f32.mrb[7].mxu0 }
 0x56c   : > { %v1117_v33 = vpop.permute.xlu0 %1116 }
 0x56d   : > { %v1154_v38 = vmul.f32 %v2133_v35, %v1117_v33 }
 0x56f   : > { %v1162_v48 = vrot.slane %v1154_v38, 4 }
 0x570   : > { %v1122_v43 = vpop.permute.xlu0 %1121 }
 0x571   : > { %v1155_v45 = vmul.f32 %v2134_v34, %v1122_v43  ;;  %v1163_v60 = vadd.f32 %v1162_v48, %v1154_v38 }
 0x573   : > { %v1168_v49 = vrot.slane %v1155_v45, 4  ;;  %v1164_v32 = vrot.slane %v1163_v60, 2 }
 0x574   : > { %v1127_v42 = vpop.permute.xlu0 %1126 }
 0x575   : > { %v1156_v46 = vmul.f32 %v2137_v37, %v1127_v42  ;;  %v1169_v55 = vadd.f32 %v1168_v49, %v1155_v45  ;;  %v1165_v24 = vadd.f32 %v1164_v32, %v1163_v60 }
 0x577   : > { %v1174_v54 = vrot.slane %v1156_v46, 4  ;;  %v1170_v57 = vrot.slane %v1169_v55, 2  ;;  %v1166_v30 = vrot.slane %v1165_v24, 1 }
 0x578   : > { %v1132_v52 = vpop.permute.xlu0 %1131 }
 0x579   : > { %v1157_v56 = vmul.f32 %v2138_v47, %v1132_v52  ;;  %v1175_v40 = vadd.f32 %v1174_v54, %v1156_v46  ;;  %v1171_v8 = vadd.f32 %v1170_v57, %v1169_v55  ;;  %v1167_v49 = vadd.f32 %v1166_v30, %v1165_v24 }
 0x57b   : > { %v1180_v61 = vrot.slane %v1157_v56, 4  ;;  %v1176_v1 = vrot.slane %v1175_v40, 2  ;;  %v1172_v25 = vrot.slane %v1171_v8, 1 }
 0x57c   : > { %v1137_v62 = vpop.permute.xlu0 %1136 }
 0x57d   : > { %v1181_v63 = vadd.f32 %v1180_v61, %v1157_v56  ;;  %v1158_v58 = vmul.f32 %v2141_v28, %v1137_v62  ;;  %v1177_v16 = vadd.f32 %v1176_v1, %v1175_v40  ;;  %v1173_v45 = vadd.f32 %v1172_v25, %v1171_v8 }
 0x57e   : > { %v1210_v61 = vpack.c.bf16 %v1167_v49, %v1167_v49 }
 0x57f   : > { %v1182_v3 = vrot.slane %v1181_v63, 2  ;;  %v1186_v6 = vrot.slane %v1158_v58, 4  ;;  %v1178_v31 = vrot.slane %v1177_v16, 1  ;;  %v1211_v55 = vpack.c.bf16 %v1173_v45, %v1173_v45 }
 0x580   : > { %v1142_v59 = vpop.permute.xlu0 %1141  ;;  %v1535_v5 = vunpack.c.l.b16 %v1210_v61 }
 0x581   : > { %v1159_v9 = vmul.f32 %v2142_v0, %v1142_v59  ;;  %v1187_v39 = vadd.f32 %v1186_v6, %v1158_v58  ;;  %v1183_v18 = vadd.f32 %v1182_v3, %v1181_v63  ;;  %v1179_v46 = vadd.f32 %v1178_v31, %v1177_v16 }
 0x582   : > { %v1536_v32 = vunpack.c.l.b16 %v1211_v55 }
 0x583   : > { %v1192_v21 = vrot.slane %v1159_v9, 4  ;;  %v1188_v22 = vrot.slane %v1187_v39, 2  ;;  %v1184_v33 = vrot.slane %v1183_v18, 1  ;;  %v1212_v28 = vpack.c.bf16 %v1179_v46, %v1179_v46 }
 0x584   : > { %v1147_v23 = vpop.permute.xlu0 %1146 }
 0x585   : > { %v1193_v26 = vadd.f32 %v1192_v21, %v1159_v9  ;;  %v1160_v27 = vmul.f32 %v2145_v10, %v1147_v23  ;;  %v1189_v53 = vadd.f32 %v1188_v22, %v1187_v39  ;;  %v1185_v47 = vadd.f32 %v1184_v33, %v1183_v18 }
 0x586   : > { %v1537_v3 = vunpack.c.l.b16 %v1212_v28  ;;  %v1543_v9 = vsel %vm889_vm0, %v1536_v32, %v1535_v5  ;;  %v2558_v32 = vld [vmem:[#allocation13 + $0x10] sm:$0xff] (%p290_p6)  }
 0x587   : > { %v1194_v34 = vrot.slane %v1193_v26, 2  ;;  %v1198_v35 = vrot.slane %v1160_v27, 4  ;;  %v1190_v44 = vrot.slane %v1189_v53, 1  ;;  %v1213_v62 = vpack.c.bf16 %v1185_v47, %v1185_v47 }
 0x588   : > { %v1152_v43 = vpop.permute.xlu0 %1151  ;;  %v1544_v15 = vsel %vm891_vm1, %v1537_v3, %v1543_v9  ;;  %v2563_v3 = vld [vmem:[#allocation13 + $0x38] sm:$0xff] (%p290_p6)  }
 0x589   : > { %v1195_v37 = vadd.f32 %v1194_v34, %v1193_v26  ;;  %v1199_v38 = vadd.f32 %v1198_v35, %v1160_v27  ;;  %v1161_v42 = vmul.f32 %v2146_v29, %v1152_v43  ;;  %v1191_v52 = vadd.f32 %v1190_v44, %v1189_v53  ;;  %v2555_v26 = vld [vmem:[%s3149_s3] sm:$0x1f] }
 0x58a   : > { %v1538_v6 = vunpack.c.l.b16 %v1213_v62  ;;  %v354_v27 = vrot.slane %v2555_v26, %v3004_v13  ;;  %v362_v29 = vrot.slane %v2555_v26, %v3007_v14  ;;  %v358_v30 = vrot.slane %v2555_v26, %v3001_v12 }
 0x58b   : > { %v1196_v48 = vrot.slane %v1195_v37, 1  ;;  %v1200_v54 = vrot.slane %v1199_v38, 2  ;;  %v1204_v50 = vrot.slane %v1161_v42, 4  ;;  %v1214_v0 = vpack.c.bf16 %v1191_v52, %v1191_v52 }
 0x58c   : > { %v1545_v16 = vsel %vm893_vm2, %v1538_v6, %v1544_v15  ;;  %v366_v31 = vrot.slane %v2555_v26, %v3013_v19  ;;  %v617_v53 = vadd.f32 %v2967_v51, %v354_v27  ;;  %v658_v33 = vadd.f32 %v3099_v4, %v362_v29  ;;  %v2122_v15 = vld [vmem:[%s3154_s8] ss:$0 sm:$0xff] (%p290_p6)  ;;  %s2696_s8 = scalar_lea.vmem (%p290_p6), %s1971_s2, 640 }
 0x58d   : > { %v1197_v56 = vadd.f32 %v1196_v48, %v1195_v37  ;;  %v1201_v60 = vadd.f32 %v1200_v54, %v1199_v38  ;;  %v1205_v40 = vadd.f32 %v1204_v50, %v1161_v42  ;;  %v1539_v8 = vunpack.c.l.b16 %v1214_v0  ;;  %v2557_v0 = vld [vmem:[#allocation13 + $0x8] sm:$0xff] (%p290_p6)   ;;  %p2697_p7 = scmp.ne.s32.totalorder (%p290_p6), %s1971_s2, %s2696_s8  ;;  %p2702_p9 = scmp.lt.s32.totalorder (%p290_p6), %s2696_s8, %s2696_s8 }
 0x58e   : > { %v656_v34 = vadd.f32 %v3095_v36, %v358_v30  ;;  %v697_v35 = vadd.f32 %v3097_v2, %v366_v31 }
 0x58f   : > { %v1202_v57 = vrot.slane %v1201_v60, 1  ;;  %v1206_v63 = vrot.slane %v1205_v40, 2  ;;  %v1215_v1 = vpack.c.bf16 %v1197_v56, %v1197_v56  ;;  %v1546_v17 = vsel %vm895_vm3, %v1539_v8, %v1545_v16  ;;  %p2703_p10 = por (%p290_p6), %p2702_p9, %p2701_p8 }
 0x591   : > { %v1203_v58 = vadd.f32 %v1202_v57, %v1201_v60  ;;  %v1207_v41 = vadd.f32 %v1206_v63, %v1205_v40  ;;  %v1540_v10 = vunpack.c.l.b16 %v1215_v1  ;;  %v2556_v57 = vld [vmem:[#allocation13] sm:$0xff] (%p290_p6)   ;;  %v2768_v63 = vmov (%p290_p6), 0.0   ;;  %p2704_p11 = pnand (%p290_p6), %p2703_p10, %p2697_p7 }
 0x592   :  { %2278 = vmatprep.subr.bf16.mxu1 (%p290_p6), %v2768_v63  ;;  %2226 = vmatprep.subr.bf16.mxu0 (%p290_p6), %v2768_v63  ;;  %v2560_v1 = vld [vmem:[#allocation13 + $0x20] sm:$0xff] (%p290_p6)  }
 0x593   : > { %v1216_v59 = vpack.c.bf16 %v1203_v58, %v1203_v58  ;;  %v1208_v7 = vrot.slane %v1207_v41, 1  ;;  %v1547_v18 = vsel %vm897_vm4, %v1540_v10, %v1546_v17  ;;  %v2561_v58 = vld [vmem:[#allocation13 + $0x28] sm:$0xff] (%p290_p6)  }
 0x595   : > { %v1209_v11 = vadd.f32 %v1208_v7, %v1207_v41  ;;  %v1541_v24 = vunpack.c.l.b16 %v1216_v59  ;;  %v2562_v41 = vld [vmem:[#allocation13 + $0x30] sm:$0xff] (%p290_p6)  }
 0x597   : > { %v1217_v39 = vpack.c.bf16 %v1209_v11, %v1209_v11  ;;  %v1548_v22 = vsel %vm899_vm5, %v1541_v24, %v1547_v18 }
 0x599   : > { %v1542_v21 = vunpack.c.l.b16 %v1217_v39 }
 0x59b   : > { %v1549_v23 = vsel %vm901_vm6, %v1542_v21, %v1548_v22 }
 0x59c   : > { %v1550_v25 = vpack.c.b16 %v1549_v23, %v1549_v23 }
 0x59e   : > { %1745 = vmatmul.mubr.bf16.vlgmr.msra.gmra.mrb[4].mxu1 %v1550_v25  ;;  %1786 = vmatmul.mubr.bf16.vlgmr.msra.gmra.mrb[8].mxu0 %v1550_v25 }
 0x59f   :  { %2286 = vmatpush3.bf16.msra.mxu1 (%p290_p6), %v2556_v57  ;;  %2227 = vmatpush3.bf16.msra.mxu0 (%p290_p6), %v2556_v57 }
 0x5a0   :  { %2279 = vmatprep.subr.bf16.mxu1 (%p290_p6), %v2768_v63  ;;  %2228 = vmatprep.subr.bf16.mxu0 (%p290_p6), %v2768_v63 }
 0x5a1   :  { %2246 = vmatprep.mubr.msk.bf16.mxu1 (%p290_p6), %vm2769_vm9, %v2768_v63  ;;  %2242 = vmatprep.mubr.msk.bf16.mxu0 (%p290_p6), %vm2769_vm9, %v2768_v63 }
 0x5a3   :  { %2287 = vmatpush3.bf16.msra.mxu1 (%p290_p6), %v2557_v0  ;;  %2229 = vmatpush3.bf16.msra.mxu0 (%p290_p6), %v2557_v0 }
 0x5a4   :  { %2280 = vmatprep.subr.bf16.mxu1 (%p290_p6), %v2768_v63  ;;  %2230 = vmatprep.subr.bf16.mxu0 (%p290_p6), %v2768_v63 }
 0x5a7   :  { %2288 = vmatpush3.bf16.msra.mxu1 (%p290_p6), %v2558_v32  ;;  %2231 = vmatpush3.bf16.msra.mxu0 (%p290_p6), %v2558_v32 }
 0x5a8   :  { %2281 = vmatprep.subr.bf16.mxu1 (%p290_p6), %v2768_v63  ;;  %2232 = vmatprep.subr.bf16.mxu0 (%p290_p6), %v2768_v63 }
 0x671   : > { %v1746_v44 = vpop.f32.mrb[4].mxu1  ;;  %v1787_v43 = vpop.f32.mrb[8].mxu0 }
 0x672   : > { %v1794_v45 = vadd.f32 %v1746_v44, %v617_v53  ;;  %v1796_v37 = vadd.f32 %v1787_v43, %v658_v33  ;;  %v1748_v38 = vpop.f32.mrb[5].mxu1  ;;  %v1789_v13 = vpop.f32.mrb[9].mxu0 }
 0x673   : > { %v1795_v42 = vadd.f32 %v1748_v38, %v656_v34  ;;  %v1797_v14 = vadd.f32 %v1789_v13, %v697_v35  ;;  %v1750_v49 = vpop.f32.mrb[6].mxu1  ;;  %v1791_v12 = vpop.f32.mrb[10].mxu0 }
 0x674   : > { %v2118_v46 = vmul.f32 -1.442695, %v1794_v45  ;;  %v1751_v19 = vpop.f32.mrb[7].mxu1  ;;  %v1792_v47 = vpop.f32.mrb[11].mxu0 }
 0x675   : > { %v2119_v51 = vmul.f32 -1.442695, %v1795_v42  ;;  %v2120_v4 = vmul.f32 -1.442695, %v1797_v14 }
 0x676   : > { %2539 = vpow2.f32 %v2118_v46 }
 0x677   : > { %2541 = vpow2.f32 %v2119_v51 }
 0x678   : > { %2543 = vpow2.f32 %v2120_v4 }
 0x679   : > { %2545 = vtanh.f32 %v1796_v37 }
 0x680   : > { %v2540_v36 = vpop.eup %2539 }
 0x681   : > { %v2542_v48 = vpop.eup %2541  ;;  %v1801_v2 = vadd.f32 1.0, %v2540_v36 }
 0x682   : > { %v1807_v54 = vadd.f32 1.0, %v2542_v48  ;;  %v2544_v50 = vpop.eup %2543 }
 0x683   : > { %2547 = vrcp.f32 %v1801_v2  ;;  %v2546_v52 = vpop.eup %2545  ;;  %v1814_v40 = vadd.f32 1.0, %v2544_v50 }
 0x684   : > { %2549 = vrcp.f32 %v1807_v54 }
 0x685   : > { %2551 = vrcp.f32 %v1814_v40 }
 0x68d   : > { %v2548_v55 = vpop.eup %2547 }
 0x68e   : > { %v2550_v56 = vpop.eup %2549  ;;  %v1818_v60 = vmul.f32 %v2548_v55, %v2546_v52 }
 0x68f   : > { %v1817_v28 = vmul.f32 %v2742_v20, %v2550_v56  ;;  %v2552_v61 = vpop.eup %2551 }
 0x691   : > { %v1819_v20 = vadd.f32 %v1818_v60, %v1817_v28  }
 0x693   : > { %2553 = vtanh.f32 %v1819_v20  ;;  %v2559_v20 = vld [vmem:[#allocation13 + $0x18] sm:$0xff] (%p290_p6)  }
 0x694   :  { %2289 = vmatpush3.bf16.msra.mxu1 (%p290_p6), %v2559_v20  ;;  %2233 = vmatpush3.bf16.msra.mxu0 (%p290_p6), %v2559_v20 }
 0x695   :  { %2282 = vmatprep.subr.bf16.mxu1 (%p290_p6), %v2768_v63  ;;  %2234 = vmatprep.subr.bf16.mxu0 (%p290_p6), %v2768_v63 }
 0x698   :  { %2290 = vmatpush3.bf16.msra.mxu1 (%p290_p6), %v2560_v1  ;;  %2235 = vmatpush3.bf16.msra.mxu0 (%p290_p6), %v2560_v1 }
 0x699   :  { %2283 = vmatprep.subr.bf16.mxu1 (%p290_p6), %v2768_v63  ;;  %2236 = vmatprep.subr.bf16.mxu0 (%p290_p6), %v2768_v63 }
 0x69a   :  { %292 = sbr.rel (!%p290_p6) target bundleno = 359 (0x167), region = 93 }
 0x69c   :  { %2291 = vmatpush3.bf16.msra.mxu1 (%p290_p6), %v2561_v58  ;;  %2237 = vmatpush3.bf16.msra.mxu0 (%p290_p6), %v2561_v58 }
 0x69d   : > { %v2554_v62 = vpop.eup %2553  ;;  %2284 = vmatprep.subr.bf16.mxu1 (%p290_p6), %v2768_v63  ;;  %2238 = vmatprep.subr.bf16.mxu0 (%p290_p6), %v2768_v63 }
 0x69e   : > { %v1821_v21 = vmul.f32 %v2554_v62, %v2552_v61  }
 0x6a0   : > { %1824 = vst [vmem:[%s1823_s21] sm:$0xff] %v1821_v21  ;;  %2292 = vmatpush3.bf16.msra.mxu1 (%p290_p6), %v2562_v41  ;;  %2239 = vmatpush3.bf16.msra.mxu0 (%p290_p6), %v2562_v41 }
 0x6a1   :  { %2285 = vmatprep.subr.bf16.mxu1 %v2768_v63  ;;  %2240 = vmatprep.subr.bf16.mxu0 %v2768_v63 }
 0x6a4   :  { %2293 = vmatpush3.bf16.msra.mxu1 %v2563_v3  ;;  %2241 = vmatpush3.bf16.msra.mxu0 %v2563_v3 }
 0x6a7   :  { %v1827_v5 = vld [vmem:[#allocation3 + $0x10] sm:$0xff]  ;;  %v1828_v6 = vld [vmem:[#allocation3 + $0x18] sm:$0xff]  ;;  %v1825_v59 = vld [vmem:[#allocation3] sm:$0xff] }
 0x6a8   :  { %v1826_v7 = vld [vmem:[#allocation3 + $0x8] sm:$0xff]  ;;  %v1831_v8 = vpack.c.bf16 %v1828_v6, %v1827_v5  ;;  %v1829_v10 = vld [vmem:[#allocation3 + $0x20] sm:$0xff] }
 0x6a9   :  { %v1830_v9 = vpack.c.bf16 %v1826_v7, %v1825_v59  ;;  %v1832_v11 = vpack.c.bf16 %v1829_v10, %v1829_v10 }
 0x6aa   :  { %2247 = vmatmul.mubr.bf16.vlgmr.msra.gmra.mrb[0].mxu1 %v1831_v8 }
 0x6ab   :  { %2243 = vmatmul.mubr.bf16.vlgmr.msra.gmra.mrb[0].mxu0 %v1830_v9  ;;  %2250 = vmatprep.mubr.msk.bf16.mxu1 %vm2769_vm9, %v2768_v63 }
 0x6b2   :  { %2251 = vmatmul.mubr.bf16.gmra.mrb[4].mxu1 %v1832_v11 }
 0x77d   :  { %v1946_v24 = vpop.f32.mrb[0].mxu1 }
 0x77e   :  { %v1938_v16 = vpop.f32.mrb[0].mxu0  ;;  %v1947_v39 = vadd.f32 %v2122_v15, %v1946_v24  ;;  %v2248_v17 = vpop.f32.mrb[1].mxu1 }
 0x77f   :  { %v1939_v18 = vadd.f32 %v2122_v15, %v1938_v16  ;;  %v2244_v21 = vpop.f32.mrb[1].mxu0  ;;  %v1949_v22 = vpop.f32.mrb[2].mxu1 }
 0x780   :  { %v1941_v23 = vpop.f32.mrb[2].mxu0  ;;  %1962 = vst [vmem:[#allocation15 + $0x10] sm:$0xff] %v1947_v39  ;;  %v1950_v25 = vadd.f32 %v2122_v15, %v1949_v22  ;;  %v2249_v26 = vpop.f32.mrb[3].mxu1 }
 0x781   :  { %1960 = vst [vmem:[#allocation15] sm:$0xff] %v1939_v18  ;;  %v1942_v27 = vadd.f32 %v2122_v15, %v1941_v23  ;;  %v2245_v29 = vpop.f32.mrb[3].mxu0 }
 0x782   :  { %1963 = vst [vmem:[#allocation15 + $0x18] sm:$0xff] %v1950_v25 }
 0x783   :  { %1961 = vst [vmem:[#allocation15 + $0x8] sm:$0xff] %v1942_v27 }
 0x785   :  { %v1954_v30 = vpop.f32.mrb[4].mxu1 }
 0x786   :  { %v1955_v31 = vadd.f32 %v2122_v15, %v1954_v30  ;;  %v2252_v53 = vpop.f32.mrb[5].mxu1 }
 0x787   :  { %v1957_v33 = vpop.f32.mrb[6].mxu1 }
 0x788   :  { %1964 = vst [vmem:[#allocation15 + $0x20] sm:$0xff] %v1955_v31  ;;  %v2253_v34 = vpop.f32.mrb[7].mxu1 }
 0x789   :  { %2707 = shalt.err (!%p2704_p11)
}
 0x78a   :  { %s2708_s27 = scalar_lea.hbm %s3156_s10, 640 }
 0x78b   :  { %p2709_p12 = scmp.ne.s32.totalorder %s3156_s10, %s2708_s27  ;;  %p2712_p13 = scmp.lt.u32.totalorder %s2708_s27, %s3156_s10 }
 0x78d   :  { %p2714_p0 = pnand %p2712_p13, %p2709_p12 }
 0x78f   :  { %2717 = shalt.err (!%p2714_p0)
}
 0x790   :  { %s2771_s30 = smov 128   ;;  %s2772_s11 = smov 8  }
 0x791   :  { %1976 = dma.vmem_to_hbm [thread:$0]  %s1971_s2, 640, %s3156_s10, [#allocation6], %s2771_s30, %s2771_s30, %s2772_s11  }
 0x792   :  { %2738 = dma.done.wait [#allocation6], 640  }
 0x793   :  { %2739 = vsyncadd [#allocation6], 4294966656 }
 0x794   :  { %1980 = vsyncpa [#allocation5], 1 }
 0x795   :  { %1981 = vsyncpa [#allocation8], 1 }
 0x796   :  { %1982 = vsyncpa [#allocation11], 1 }
 0x797   :  { %1983 = vsyncpa [#allocation14], 1 }
 0x798   :  { %1984 = vsyncpa [#allocation6], 1 }

</bundles_post_ra>
